<compile_context>
chip_gen: v7x
topology: tpu7x:2x2x1
jax: 0.10.0
libtpu: 0.0.40
codegen_flags: <defaults>
</compile_context>

<pallas_src>
import functools
from math import log

import jax
import jax.numpy as jnp
from jax import lax
from jax.experimental import pallas as pl
from jax.experimental.pallas import tpu as pltpu


# 3x3-conv tap order: (dy = vertical shift, s = packed-group horizontal shift)
_TAPS = tuple((dy, s) for dy in (-1, 0, 1) for s in (-1, 0, 1))


def _efm_kernel(c_ref, att_ref, wcol_ref, scale_ref, bias_ref, m4_ref,
                out_ref, *, H, Wg, PC, inv_hw):
    """One batch element in packed layout: rows = H*Wg, lanes = P*C (=128)."""
    HWg = H * Wg

    cp = c_ref[0]                       # (HWg, PC)
    ap = att_ref[0]
    x = cp * ap + cp                    # x = c*att + c              (VPU)

    # row index for halo masking (TPU iota must be >= 2-D)
    r = lax.broadcasted_iota(jnp.int32, (HWg, 1), 0)

    # im2col: 9 shifted + edge-masked copies concatenated along lanes
    cols = []
    for dy, s in _TAPS:
        d = dy * Wg + s                 # shift in flattened (h, wg) rows
        xs = x if d == 0 else pltpu.roll(x, (HWg - d) % HWg, 0)  # xs[r] = x[r+d]
        conds = []
        if dy == -1:
            conds.append(r >= Wg)                    # top edge    -> zero pad
        if dy == 1:
            conds.append(r < (H - 1) * Wg)           # bottom edge -> zero pad
        if s == -1:
            conds.append((r % Wg) != 0)              # left edge   -> zero pad
        if s == 1:
            conds.append((r % Wg) != (Wg - 1))       # right edge  -> zero pad
        if conds:
            valid = conds[0]
            for cnd in conds[1:]:
                valid = jnp.logical_and(valid, cnd)
            xs = jnp.where(valid, xs, 0.0)
        cols.append(xs)
    xcol = jnp.concatenate(cols, axis=-1)            # (HWg, 9*PC)

    # 3x3 conv == ONE (HWg, 9*PC) @ (9*PC, PC) MXU matmul
    y = jnp.dot(xcol, wcol_ref[...], preferred_element_type=jnp.float32)

    # fused inference BatchNorm + ReLU
    y = jnp.maximum(y * scale_ref[...] + bias_ref[...], 0.0)      # (HWg, PC)

    # AdaptiveAvgPool2d(1): spatial sum over rows; the fold over pack slots and
    # the channel-wise Conv1d are combined into m4 (built once in the wrapper).
    pooled = jnp.sum(y, axis=0, keepdims=True) * inv_hw           # (1, PC)
    wei = jax.nn.sigmoid(
        jnp.dot(pooled, m4_ref[...], preferred_element_type=jnp.float32))

    out_ref[...] = (y * wei).reshape(1, HWg, PC)     # lane-dense full-width store


def _pack_factor(C, W):
    """How many W positions we pack into the 128-lane axis."""
    if C <= 128 and 128 % C == 0:
        P = 128 // C
        if W % P == 0:
            return P
    return 1


def efm_forward_nhwc(c_nhwc, att_nhwc, wconv, bn_gamma, bn_beta, bn_mean,
                     bn_var, w1d, eps=1e-5):
    """NHWC-native fused EFM forward.  c/att: (B, H, W, C) float32, same shape."""
    # TODO(synk): F.interpolate(bilinear) branch for mismatched att size not
    # implemented; inputs must already share the spatial size of `c`.
    B, H, W, C = c_nhwc.shape
    ksz = int(w1d.shape[0])
    pad = (ksz - 1) // 2

    P = _pack_factor(C, W)
    Wg = W // P
    PC = P * C
    HWg = H * Wg

    # pack: (B,H,W,C) -> (B, H*Wg, P*C); lane index = p*C + c  (pure reshape)
    c_p = c_nhwc.reshape(B, HWg, PC)
    att_p = att_nhwc.reshape(B, HWg, PC)

    # conv weight (Cout, Cin, 3, 3) -> per-tap packed (PC, PC) block matrices,
    # stacked along the contraction axis into a single (9*PC, PC) im2col weight
    k2 = jnp.transpose(wconv, (2, 3, 1, 0)).astype(jnp.float32)   # (3,3,Cin,Cout)
    qq = jnp.arange(P)[:, None]
    pp = jnp.arange(P)[None, :]
    blocks = []
    for dy, s in _TAPS:
        dx = s * P + qq - pp                                      # (P, P)
        sel = jax.nn.one_hot(dx + 1, 3, dtype=jnp.float32)        # 0 if |dx|>1
        wt = jnp.einsum('qpk,kio->qipo', sel, k2[dy + 1]).reshape(PC, PC)
        blocks.append(wt)
    wcol = jnp.concatenate(blocks, axis=0)                        # (9*PC, PC)

    # fold BatchNorm (inference) into per-channel scale/bias, tiled per pack slot
    inv_std = 1.0 / jnp.sqrt(bn_var + eps)
    scale = jnp.tile((bn_gamma * inv_std).reshape(1, C), (1, P))
    bias = jnp.tile((bn_beta - bn_mean * bn_gamma * inv_std).reshape(1, C), (1, P))

    # banded Toeplitz for the channel-wise Conv1d ...
    band = jnp.zeros((C, C), jnp.float32)
    for j in range(ksz):
        band = band + w1d[j] * jnp.eye(C, k=pad - j, dtype=jnp.float32)
    # ... combined with the fold over pack slots (avg-pool finish) and replicated
    # over output pack slots: one (PC, PC) matrix.
    m4 = jnp.kron(jnp.ones((P, P), jnp.float32), band)

    kernel = functools.partial(_efm_kernel, H=H, Wg=Wg, PC=PC,
                               inv_hw=1.0 / float(H * W))

    out = pl.pallas_call(
        kernel,
        out_shape=jax.ShapeDtypeStruct((B, HWg, PC), jnp.float32),
        grid=(B,),
        in_specs=[
            pl.BlockSpec((1, HWg, PC), lambda b: (b, 0, 0)),   # c   (packed)
            pl.BlockSpec((1, HWg, PC), lambda b: (b, 0, 0)),   # att (packed)
            pl.BlockSpec((9 * PC, PC), lambda b: (0, 0)),      # conv2d im2col weight
            pl.BlockSpec((1, PC), lambda b: (0, 0)),           # BN scale
            pl.BlockSpec((1, PC), lambda b: (0, 0)),           # BN bias
            pl.BlockSpec((PC, PC), lambda b: (0, 0)),          # pool-fold + conv1d
        ],
        out_specs=pl.BlockSpec((1, HWg, PC), lambda b: (b, 0, 0)),
        compiler_params=pltpu.CompilerParams(
            dimension_semantics=("parallel",)),
    )(c_p, att_p, wcol, scale, bias, m4)

    return out.reshape(B, H, W, C)


def efm_forward(c_nchw, att_nchw, *params, **kw):
    """NCHW shim matching the PyTorch interface (prefer efm_forward_nhwc to
    avoid the entry/exit transposes when the surrounding model is NHWC)."""
    c = jnp.transpose(c_nchw, (0, 2, 3, 1))
    att = jnp.transpose(att_nchw, (0, 2, 3, 1))
    out = efm_forward_nhwc(c, att, *params, **kw)
    return jnp.transpose(out, (0, 3, 1, 2))


def efm_reference(c, att, wconv, gamma, beta, mean, var, w1d, eps=1e-5):
    """Pure-JAX reference in NCHW, mirroring the PyTorch forward (BN in eval mode)."""
    x = c * att + c
    y = lax.conv_general_dilated(
        x, wconv, window_strides=(1, 1), padding=((1, 1), (1, 1)),
        dimension_numbers=("NCHW", "OIHW", "NCHW"))
    y = (y - mean[None, :, None, None]) / jnp.sqrt(var + eps)[None, :, None, None]
    y = y * gamma[None, :, None, None] + beta[None, :, None, None]
    y = jnp.maximum(y, 0.0)
    w = jnp.mean(y, axis=(2, 3))                      # (B, C)
    ksz = w1d.shape[0]
    pad = (ksz - 1) // 2
    wp = jnp.pad(w, ((0, 0), (pad, pad)))
    conv = jnp.zeros_like(w)
    for j in range(ksz):
        conv = conv + w1d[j] * wp[:, j:j + w.shape[1]]
    wei = jax.nn.sigmoid(conv)[:, :, None, None]
    return y * wei


if __name__ == "__main__":
    B, C, H, W = 2, 32, 16, 16

    # Conv1d kernel size per EFM.__init__
    t = int(abs((log(C, 2) + 1) / 2))
    k_conv1d = t if t % 2 else t + 1                   # C=32 -> k=3

    key = jax.random.PRNGKey(0)
    k1, k2, k3, k4, k5, k6, k7, k8 = jax.random.split(key, 8)
    c = jax.random.normal(k1, (B, C, H, W), jnp.float32)
    att = jax.random.normal(k2, (B, C, H, W), jnp.float32)

    # Deterministic synthetic parameters
    wconv = jax.random.normal(k3, (C, C, 3, 3), jnp.float32) * 0.1   # Conv2d weight
    gamma = jax.random.uniform(k4, (C,), jnp.float32, 0.5, 1.5)      # BN gamma
    beta = jax.random.normal(k5, (C,), jnp.float32) * 0.1            # BN beta
    bn_mean = jax.random.normal(k6, (C,), jnp.float32) * 0.1         # BN running mean
    bn_var = jax.random.uniform(k7, (C,), jnp.float32, 0.5, 1.5)     # BN running var
    w1d = jax.random.normal(k8, (k_conv1d,), jnp.float32) * 0.5      # Conv1d weight

    fwd = jax.jit(efm_forward)
    out = fwd(c, att, wconv, gamma, beta, bn_mean, bn_var, w1d)
    out = jax.block_until_ready(out)

    ref = efm_reference(c, att, wconv, gamma, beta, bn_mean, bn_var, w1d)
    err = float(jnp.max(jnp.abs(out - ref)))
    assert out.shape == (B, C, H, W), out.shape
    assert jnp.allclose(out, ref, atol=1e-3, rtol=1e-3), f"max abs err {err}"

    print("KERNEL_OK")
</pallas_src>

<mosaic_0001>
module attributes {stable_mosaic.version = 11 : i64} {
  func.func @_efm_kernel(%arg0: i32, %arg1: memref<1x64x128xf32, #tpu.memory_space<vmem>>, %arg2: memref<1x64x128xf32, #tpu.memory_space<vmem>>, %arg3: memref<1152x128xf32, #tpu.memory_space<vmem>>, %arg4: memref<1x128xf32, #tpu.memory_space<vmem>>, %arg5: memref<1x128xf32, #tpu.memory_space<vmem>>, %arg6: memref<128x128xf32, #tpu.memory_space<vmem>>, %arg7: memref<1x64x128xf32, #tpu.memory_space<vmem>>) attributes {dimension_semantics = [#tpu.dimension_semantics<parallel>], iteration_bounds = array<i64: 2>, scalar_prefetch = 0 : i64, scratch_operands = 0 : i64, tpu.core_type = #tpu.core_type<tc>, window_params = [{transform_indices = @transform_0, window_bounds = array<i64: 1, 64, 128>}, {transform_indices = @transform_1, window_bounds = array<i64: 1, 64, 128>}, {pipeline_mode = #tpu.pipeline_mode<synchronous>, transform_indices = @transform_2, window_bounds = array<i64: 1152, 128>}, {pipeline_mode = #tpu.pipeline_mode<synchronous>, transform_indices = @transform_3, window_bounds = array<i64: 1, 128>}, {pipeline_mode = #tpu.pipeline_mode<synchronous>, transform_indices = @transform_4, window_bounds = array<i64: 1, 128>}, {pipeline_mode = #tpu.pipeline_mode<synchronous>, transform_indices = @transform_5, window_bounds = array<i64: 128, 128>}, {transform_indices = @transform_6, window_bounds = array<i64: 1, 64, 128>}]} {
    %c0 = arith.constant 0 : index
    %c0_0 = arith.constant 0 : index
    %c0_1 = arith.constant 0 : index
    %0 = vector.load %arg1[%c0, %c0_0, %c0_1] : memref<1x64x128xf32, #tpu.memory_space<vmem>>, vector<1x64x128xf32>
    %1 = vector.shape_cast %0 : vector<1x64x128xf32> to vector<64x128xf32>
    %c0_2 = arith.constant 0 : index
    %c0_3 = arith.constant 0 : index
    %c0_4 = arith.constant 0 : index
    %2 = vector.load %arg2[%c0_2, %c0_3, %c0_4] : memref<1x64x128xf32, #tpu.memory_space<vmem>>, vector<1x64x128xf32>
    %3 = vector.shape_cast %2 : vector<1x64x128xf32> to vector<64x128xf32>
    %4 = arith.mulf %1, %3 : vector<64x128xf32>
    %5 = arith.addf %4, %1 : vector<64x128xf32>
    %6 = tpu.iota {dimensions = array<i32: 0>} : vector<64x1xi32>
    %c5_i32 = arith.constant 5 : i32
    %7 = tpu.dynamic_rotate %5 by %c5_i32 dim 0 : vector<64x128xf32>, i32 -> vector<64x128xf32>
    %c4_i32 = arith.constant 4 : i32
    %8 = vector.broadcast %c4_i32 : i32 to vector<64x1xi32>
    %9 = arith.cmpi sge, %6, %8 : vector<64x1xi32>
    %c4_i32_5 = arith.constant 4 : i32
    %c0_i32 = arith.constant 0 : i32
    %10 = arith.cmpi eq, %c4_i32_5, %c0_i32 : i32
    %c1_i32 = arith.constant 1 : i32
    %11 = arith.select %10, %c1_i32, %c4_i32_5 : i32
    %12 = vector.broadcast %11 : i32 to vector<64x1xi32>
    %13 = arith.remsi %6, %12 : vector<64x1xi32>
    %c0_i32_6 = arith.constant 0 : i32
    %14 = vector.broadcast %c0_i32_6 : i32 to vector<64x1xi32>
    %15 = arith.cmpi ne, %13, %14 : vector<64x1xi32>
    %c0_i32_7 = arith.constant 0 : i32
    %16 = vector.broadcast %c0_i32_7 : i32 to vector<64x1xi32>
    %17 = arith.cmpi slt, %13, %16 : vector<64x1xi32>
    %c0_i32_8 = arith.constant 0 : i32
    %18 = arith.cmpi slt, %11, %c0_i32_8 : i32
    %19 = vector.broadcast %18 : i1 to vector<64x1xi1>
    %20 = vector.broadcast %19 : vector<64x1xi1> to vector<64x1xi1>
    %21 = arith.xori %17, %20 : vector<64x1xi1>
    %22 = arith.andi %21, %15 : vector<64x1xi1>
    %23 = vector.broadcast %11 : i32 to vector<64x1xi32>
    %24 = arith.addi %13, %23 : vector<64x1xi32>
    %25 = arith.select %22, %24, %13 : vector<64x1xi1>, vector<64x1xi32>
    %c0_i32_9 = arith.constant 0 : i32
    %26 = vector.broadcast %c0_i32_9 : i32 to vector<64x1xi32>
    %27 = arith.cmpi ne, %25, %26 : vector<64x1xi32>
    %28 = arith.andi %9, %27 : vector<64x1xi1>
    %cst = arith.constant 0.000000e+00 : f32
    %29 = vector.shape_cast %28 : vector<64x1xi1> to vector<64x1xi1>
    %30 = vector.broadcast %29 : vector<64x1xi1> to vector<64x128xi1>
    %31 = vector.broadcast %cst : f32 to vector<64x128xf32>
    %32 = arith.select %30, %7, %31 : vector<64x128xi1>, vector<64x128xf32>
    %c4_i32_10 = arith.constant 4 : i32
    %33 = tpu.dynamic_rotate %5 by %c4_i32_10 dim 0 : vector<64x128xf32>, i32 -> vector<64x128xf32>
    %c4_i32_11 = arith.constant 4 : i32
    %34 = vector.broadcast %c4_i32_11 : i32 to vector<64x1xi32>
    %35 = arith.cmpi sge, %6, %34 : vector<64x1xi32>
    %cst_12 = arith.constant 0.000000e+00 : f32
    %36 = vector.shape_cast %35 : vector<64x1xi1> to vector<64x1xi1>
    %37 = vector.broadcast %36 : vector<64x1xi1> to vector<64x128xi1>
    %38 = vector.broadcast %cst_12 : f32 to vector<64x128xf32>
    %39 = arith.select %37, %33, %38 : vector<64x128xi1>, vector<64x128xf32>
    %c3_i32 = arith.constant 3 : i32
    %40 = tpu.dynamic_rotate %5 by %c3_i32 dim 0 : vector<64x128xf32>, i32 -> vector<64x128xf32>
    %c4_i32_13 = arith.constant 4 : i32
    %41 = vector.broadcast %c4_i32_13 : i32 to vector<64x1xi32>
    %42 = arith.cmpi sge, %6, %41 : vector<64x1xi32>
    %c4_i32_14 = arith.constant 4 : i32
    %c0_i32_15 = arith.constant 0 : i32
    %43 = arith.cmpi eq, %c4_i32_14, %c0_i32_15 : i32
    %c1_i32_16 = arith.constant 1 : i32
    %44 = arith.select %43, %c1_i32_16, %c4_i32_14 : i32
    %45 = vector.broadcast %44 : i32 to vector<64x1xi32>
    %46 = arith.remsi %6, %45 : vector<64x1xi32>
    %c0_i32_17 = arith.constant 0 : i32
    %47 = vector.broadcast %c0_i32_17 : i32 to vector<64x1xi32>
    %48 = arith.cmpi ne, %46, %47 : vector<64x1xi32>
    %c0_i32_18 = arith.constant 0 : i32
    %49 = vector.broadcast %c0_i32_18 : i32 to vector<64x1xi32>
    %50 = arith.cmpi slt, %46, %49 : vector<64x1xi32>
    %c0_i32_19 = arith.constant 0 : i32
    %51 = arith.cmpi slt, %44, %c0_i32_19 : i32
    %52 = vector.broadcast %51 : i1 to vector<64x1xi1>
    %53 = vector.broadcast %52 : vector<64x1xi1> to vector<64x1xi1>
    %54 = arith.xori %50, %53 : vector<64x1xi1>
    %55 = arith.andi %54, %48 : vector<64x1xi1>
    %56 = vector.broadcast %44 : i32 to vector<64x1xi32>
    %57 = arith.addi %46, %56 : vector<64x1xi32>
    %58 = arith.select %55, %57, %46 : vector<64x1xi1>, vector<64x1xi32>
    %c3_i32_20 = arith.constant 3 : i32
    %59 = vector.broadcast %c3_i32_20 : i32 to vector<64x1xi32>
    %60 = arith.cmpi ne, %58, %59 : vector<64x1xi32>
    %61 = arith.andi %42, %60 : vector<64x1xi1>
    %cst_21 = arith.constant 0.000000e+00 : f32
    %62 = vector.shape_cast %61 : vector<64x1xi1> to vector<64x1xi1>
    %63 = vector.broadcast %62 : vector<64x1xi1> to vector<64x128xi1>
    %64 = vector.broadcast %cst_21 : f32 to vector<64x128xf32>
    %65 = arith.select %63, %40, %64 : vector<64x128xi1>, vector<64x128xf32>
    %c1_i32_22 = arith.constant 1 : i32
    %66 = tpu.dynamic_rotate %5 by %c1_i32_22 dim 0 : vector<64x128xf32>, i32 -> vector<64x128xf32>
    %c4_i32_23 = arith.constant 4 : i32
    %c0_i32_24 = arith.constant 0 : i32
    %67 = arith.cmpi eq, %c4_i32_23, %c0_i32_24 : i32
    %c1_i32_25 = arith.constant 1 : i32
    %68 = arith.select %67, %c1_i32_25, %c4_i32_23 : i32
    %69 = vector.broadcast %68 : i32 to vector<64x1xi32>
    %70 = arith.remsi %6, %69 : vector<64x1xi32>
    %c0_i32_26 = arith.constant 0 : i32
    %71 = vector.broadcast %c0_i32_26 : i32 to vector<64x1xi32>
    %72 = arith.cmpi ne, %70, %71 : vector<64x1xi32>
    %c0_i32_27 = arith.constant 0 : i32
    %73 = vector.broadcast %c0_i32_27 : i32 to vector<64x1xi32>
    %74 = arith.cmpi slt, %70, %73 : vector<64x1xi32>
    %c0_i32_28 = arith.constant 0 : i32
    %75 = arith.cmpi slt, %68, %c0_i32_28 : i32
    %76 = vector.broadcast %75 : i1 to vector<64x1xi1>
    %77 = vector.broadcast %76 : vector<64x1xi1> to vector<64x1xi1>
    %78 = arith.xori %74, %77 : vector<64x1xi1>
    %79 = arith.andi %78, %72 : vector<64x1xi1>
    %80 = vector.broadcast %68 : i32 to vector<64x1xi32>
    %81 = arith.addi %70, %80 : vector<64x1xi32>
    %82 = arith.select %79, %81, %70 : vector<64x1xi1>, vector<64x1xi32>
    %c0_i32_29 = arith.constant 0 : i32
    %83 = vector.broadcast %c0_i32_29 : i32 to vector<64x1xi32>
    %84 = arith.cmpi ne, %82, %83 : vector<64x1xi32>
    %cst_30 = arith.constant 0.000000e+00 : f32
    %85 = vector.shape_cast %84 : vector<64x1xi1> to vector<64x1xi1>
    %86 = vector.broadcast %85 : vector<64x1xi1> to vector<64x128xi1>
    %87 = vector.broadcast %cst_30 : f32 to vector<64x128xf32>
    %88 = arith.select %86, %66, %87 : vector<64x128xi1>, vector<64x128xf32>
    %c63_i32 = arith.constant 63 : i32
    %89 = tpu.dynamic_rotate %5 by %c63_i32 dim 0 : vector<64x128xf32>, i32 -> vector<64x128xf32>
    %c4_i32_31 = arith.constant 4 : i32
    %c0_i32_32 = arith.constant 0 : i32
    %90 = arith.cmpi eq, %c4_i32_31, %c0_i32_32 : i32
    %c1_i32_33 = arith.constant 1 : i32
    %91 = arith.select %90, %c1_i32_33, %c4_i32_31 : i32
    %92 = vector.broadcast %91 : i32 to vector<64x1xi32>
    %93 = arith.remsi %6, %92 : vector<64x1xi32>
    %c0_i32_34 = arith.constant 0 : i32
    %94 = vector.broadcast %c0_i32_34 : i32 to vector<64x1xi32>
    %95 = arith.cmpi ne, %93, %94 : vector<64x1xi32>
    %c0_i32_35 = arith.constant 0 : i32
    %96 = vector.broadcast %c0_i32_35 : i32 to vector<64x1xi32>
    %97 = arith.cmpi slt, %93, %96 : vector<64x1xi32>
    %c0_i32_36 = arith.constant 0 : i32
    %98 = arith.cmpi slt, %91, %c0_i32_36 : i32
    %99 = vector.broadcast %98 : i1 to vector<64x1xi1>
    %100 = vector.broadcast %99 : vector<64x1xi1> to vector<64x1xi1>
    %101 = arith.xori %97, %100 : vector<64x1xi1>
    %102 = arith.andi %101, %95 : vector<64x1xi1>
    %103 = vector.broadcast %91 : i32 to vector<64x1xi32>
    %104 = arith.addi %93, %103 : vector<64x1xi32>
    %105 = arith.select %102, %104, %93 : vector<64x1xi1>, vector<64x1xi32>
    %c3_i32_37 = arith.constant 3 : i32
    %106 = vector.broadcast %c3_i32_37 : i32 to vector<64x1xi32>
    %107 = arith.cmpi ne, %105, %106 : vector<64x1xi32>
    %cst_38 = arith.constant 0.000000e+00 : f32
    %108 = vector.shape_cast %107 : vector<64x1xi1> to vector<64x1xi1>
    %109 = vector.broadcast %108 : vector<64x1xi1> to vector<64x128xi1>
    %110 = vector.broadcast %cst_38 : f32 to vector<64x128xf32>
    %111 = arith.select %109, %89, %110 : vector<64x128xi1>, vector<64x128xf32>
    %c61_i32 = arith.constant 61 : i32
    %112 = tpu.dynamic_rotate %5 by %c61_i32 dim 0 : vector<64x128xf32>, i32 -> vector<64x128xf32>
    %c60_i32 = arith.constant 60 : i32
    %113 = vector.broadcast %c60_i32 : i32 to vector<64x1xi32>
    %114 = arith.cmpi slt, %6, %113 : vector<64x1xi32>
    %c4_i32_39 = arith.constant 4 : i32
    %c0_i32_40 = arith.constant 0 : i32
    %115 = arith.cmpi eq, %c4_i32_39, %c0_i32_40 : i32
    %c1_i32_41 = arith.constant 1 : i32
    %116 = arith.select %115, %c1_i32_41, %c4_i32_39 : i32
    %117 = vector.broadcast %116 : i32 to vector<64x1xi32>
    %118 = arith.remsi %6, %117 : vector<64x1xi32>
    %c0_i32_42 = arith.constant 0 : i32
    %119 = vector.broadcast %c0_i32_42 : i32 to vector<64x1xi32>
    %120 = arith.cmpi ne, %118, %119 : vector<64x1xi32>
    %c0_i32_43 = arith.constant 0 : i32
    %121 = vector.broadcast %c0_i32_43 : i32 to vector<64x1xi32>
    %122 = arith.cmpi slt, %118, %121 : vector<64x1xi32>
    %c0_i32_44 = arith.constant 0 : i32
    %123 = arith.cmpi slt, %116, %c0_i32_44 : i32
    %124 = vector.broadcast %123 : i1 to vector<64x1xi1>
    %125 = vector.broadcast %124 : vector<64x1xi1> to vector<64x1xi1>
    %126 = arith.xori %122, %125 : vector<64x1xi1>
    %127 = arith.andi %126, %120 : vector<64x1xi1>
    %128 = vector.broadcast %116 : i32 to vector<64x1xi32>
    %129 = arith.addi %118, %128 : vector<64x1xi32>
    %130 = arith.select %127, %129, %118 : vector<64x1xi1>, vector<64x1xi32>
    %c0_i32_45 = arith.constant 0 : i32
    %131 = vector.broadcast %c0_i32_45 : i32 to vector<64x1xi32>
    %132 = arith.cmpi ne, %130, %131 : vector<64x1xi32>
    %133 = arith.andi %114, %132 : vector<64x1xi1>
    %cst_46 = arith.constant 0.000000e+00 : f32
    %134 = vector.shape_cast %133 : vector<64x1xi1> to vector<64x1xi1>
    %135 = vector.broadcast %134 : vector<64x1xi1> to vector<64x128xi1>
    %136 = vector.broadcast %cst_46 : f32 to vector<64x128xf32>
    %137 = arith.select %135, %112, %136 : vector<64x128xi1>, vector<64x128xf32>
    %c60_i32_47 = arith.constant 60 : i32
    %138 = tpu.dynamic_rotate %5 by %c60_i32_47 dim 0 : vector<64x128xf32>, i32 -> vector<64x128xf32>
    %c60_i32_48 = arith.constant 60 : i32
    %139 = vector.broadcast %c60_i32_48 : i32 to vector<64x1xi32>
    %140 = arith.cmpi slt, %6, %139 : vector<64x1xi32>
    %cst_49 = arith.constant 0.000000e+00 : f32
    %141 = vector.shape_cast %140 : vector<64x1xi1> to vector<64x1xi1>
    %142 = vector.broadcast %141 : vector<64x1xi1> to vector<64x128xi1>
    %143 = vector.broadcast %cst_49 : f32 to vector<64x128xf32>
    %144 = arith.select %142, %138, %143 : vector<64x128xi1>, vector<64x128xf32>
    %c59_i32 = arith.constant 59 : i32
    %145 = tpu.dynamic_rotate %5 by %c59_i32 dim 0 : vector<64x128xf32>, i32 -> vector<64x128xf32>
    %c60_i32_50 = arith.constant 60 : i32
    %146 = vector.broadcast %c60_i32_50 : i32 to vector<64x1xi32>
    %147 = arith.cmpi slt, %6, %146 : vector<64x1xi32>
    %c4_i32_51 = arith.constant 4 : i32
    %c0_i32_52 = arith.constant 0 : i32
    %148 = arith.cmpi eq, %c4_i32_51, %c0_i32_52 : i32
    %c1_i32_53 = arith.constant 1 : i32
    %149 = arith.select %148, %c1_i32_53, %c4_i32_51 : i32
    %150 = vector.broadcast %149 : i32 to vector<64x1xi32>
    %151 = arith.remsi %6, %150 : vector<64x1xi32>
    %c0_i32_54 = arith.constant 0 : i32
    %152 = vector.broadcast %c0_i32_54 : i32 to vector<64x1xi32>
    %153 = arith.cmpi ne, %151, %152 : vector<64x1xi32>
    %c0_i32_55 = arith.constant 0 : i32
    %154 = vector.broadcast %c0_i32_55 : i32 to vector<64x1xi32>
    %155 = arith.cmpi slt, %151, %154 : vector<64x1xi32>
    %c0_i32_56 = arith.constant 0 : i32
    %156 = arith.cmpi slt, %149, %c0_i32_56 : i32
    %157 = vector.broadcast %156 : i1 to vector<64x1xi1>
    %158 = vector.broadcast %157 : vector<64x1xi1> to vector<64x1xi1>
    %159 = arith.xori %155, %158 : vector<64x1xi1>
    %160 = arith.andi %159, %153 : vector<64x1xi1>
    %161 = vector.broadcast %149 : i32 to vector<64x1xi32>
    %162 = arith.addi %151, %161 : vector<64x1xi32>
    %163 = arith.select %160, %162, %151 : vector<64x1xi1>, vector<64x1xi32>
    %c3_i32_57 = arith.constant 3 : i32
    %164 = vector.broadcast %c3_i32_57 : i32 to vector<64x1xi32>
    %165 = arith.cmpi ne, %163, %164 : vector<64x1xi32>
    %166 = arith.andi %147, %165 : vector<64x1xi1>
    %cst_58 = arith.constant 0.000000e+00 : f32
    %167 = vector.shape_cast %166 : vector<64x1xi1> to vector<64x1xi1>
    %168 = vector.broadcast %167 : vector<64x1xi1> to vector<64x128xi1>
    %169 = vector.broadcast %cst_58 : f32 to vector<64x128xf32>
    %170 = arith.select %168, %145, %169 : vector<64x128xi1>, vector<64x128xf32>
    %171 = tpu.concatenate %32, %39, %65, %88, %5, %111, %137, %144, %170 in 1 : vector<64x128xf32>, vector<64x128xf32>, vector<64x128xf32>, vector<64x128xf32>, vector<64x128xf32>, vector<64x128xf32>, vector<64x128xf32>, vector<64x128xf32>, vector<64x128xf32> -> vector<64x1152xf32>
    %c0_59 = arith.constant 0 : index
    %c0_60 = arith.constant 0 : index
    %172 = vector.load %arg3[%c0_59, %c0_60] : memref<1152x128xf32, #tpu.memory_space<vmem>>, vector<1152x128xf32>
    %cst_61 = arith.constant dense<0.000000e+00> : vector<64x128xf32>
    %173 = tpu.matmul %171, %172, %cst_61 {dimension_numbers = #tpu.dot_dimension_numbers<[1], [0], [0], [1], [0, 0, 1, 1], [], []>} : vector<64x1152xf32>, vector<1152x128xf32>, vector<64x128xf32> -> vector<64x128xf32>
    %c0_62 = arith.constant 0 : index
    %c0_63 = arith.constant 0 : index
    %174 = vector.load %arg4[%c0_62, %c0_63] : memref<1x128xf32, #tpu.memory_space<vmem>>, vector<1x128xf32>
    %175 = vector.broadcast %174 : vector<1x128xf32> to vector<64x128xf32>
    %176 = arith.mulf %173, %175 : vector<64x128xf32>
    %c0_64 = arith.constant 0 : index
    %c0_65 = arith.constant 0 : index
    %177 = vector.load %arg5[%c0_64, %c0_65] : memref<1x128xf32, #tpu.memory_space<vmem>>, vector<1x128xf32>
    %178 = vector.broadcast %177 : vector<1x128xf32> to vector<64x128xf32>
    %179 = arith.addf %176, %178 : vector<64x128xf32>
    %cst_66 = arith.constant 0.000000e+00 : f32
    %180 = vector.broadcast %cst_66 : f32 to vector<64x128xf32>
    %181 = arith.maximumf %179, %180 : vector<64x128xf32>
    %cst_67 = arith.constant dense<0.000000e+00> : vector<128xf32>
    %182 = vector.multi_reduction <add>, %181, %cst_67 [0] : vector<64x128xf32> to vector<128xf32>
    %183 = vector.shape_cast %182 : vector<128xf32> to vector<1x128xf32>
    %cst_68 = arith.constant 3.906250e-03 : f32
    %184 = vector.broadcast %cst_68 : f32 to vector<1x128xf32>
    %185 = arith.mulf %183, %184 : vector<1x128xf32>
    %c0_69 = arith.constant 0 : index
    %c0_70 = arith.constant 0 : index
    %186 = vector.load %arg6[%c0_69, %c0_70] : memref<128x128xf32, #tpu.memory_space<vmem>>, vector<128x128xf32>
    %cst_71 = arith.constant dense<0.000000e+00> : vector<1x128xf32>
    %187 = tpu.matmul %185, %186, %cst_71 {dimension_numbers = #tpu.dot_dimension_numbers<[1], [0], [0], [1], [0, 0, 1, 1], [], []>} : vector<1x128xf32>, vector<128x128xf32>, vector<1x128xf32> -> vector<1x128xf32>
    %188 = arith.negf %187 : vector<1x128xf32>
    %189 = math.exp %188 : vector<1x128xf32>
    %cst_72 = arith.constant 1.000000e+00 : f32
    %190 = vector.broadcast %cst_72 : f32 to vector<1x128xf32>
    %191 = arith.addf %190, %189 : vector<1x128xf32>
    %192 = arith.divf %190, %191 : vector<1x128xf32>
    %193 = vector.broadcast %192 : vector<1x128xf32> to vector<64x128xf32>
    %194 = arith.mulf %181, %193 : vector<64x128xf32>
    %195 = vector.shape_cast %194 : vector<64x128xf32> to vector<1x64x128xf32>
    %c0_73 = arith.constant 0 : index
    %c0_74 = arith.constant 0 : index
    %c0_75 = arith.constant 0 : index
    %196 = vector.load %arg7[%c0_73, %c0_74, %c0_75] : memref<1x64x128xf32, #tpu.memory_space<vmem>>, vector<1x64x128xf32>
    tpu.vector_store %arg7[%c0_73, %c0_74, %c0_75], %195 {strides = array<i32>} : memref<1x64x128xf32, #tpu.memory_space<vmem>>, vector<1x64x128xf32>,
    return
  }
  func.func @transform_0(%arg0: i32) -> (i32, i32, i32) {
    %c0_i32 = arith.constant 0 : i32
    %c0_i32_0 = arith.constant 0 : i32
    %c0_i32_1 = arith.constant 0 : i32
    return %arg0, %c0_i32, %c0_i32_0 : i32, i32, i32
  }
  func.func @transform_1(%arg0: i32) -> (i32, i32, i32) {
    %c0_i32 = arith.constant 0 : i32
    %c0_i32_0 = arith.constant 0 : i32
    %c0_i32_1 = arith.constant 0 : i32
    return %arg0, %c0_i32, %c0_i32_0 : i32, i32, i32
  }
  func.func @transform_2(%arg0: i32) -> (i32, i32) {
    %c0_i32 = arith.constant 0 : i32
    %c0_i32_0 = arith.constant 0 : i32
    %c0_i32_1 = arith.constant 0 : i32
    return %c0_i32, %c0_i32_0 : i32, i32
  }
  func.func @transform_3(%arg0: i32) -> (i32, i32) {
    %c0_i32 = arith.constant 0 : i32
    %c0_i32_0 = arith.constant 0 : i32
    %c0_i32_1 = arith.constant 0 : i32
    return %c0_i32, %c0_i32_0 : i32, i32
  }
  func.func @transform_4(%arg0: i32) -> (i32, i32) {
    %c0_i32 = arith.constant 0 : i32
    %c0_i32_0 = arith.constant 0 : i32
    %c0_i32_1 = arith.constant 0 : i32
    return %c0_i32, %c0_i32_0 : i32, i32
  }
  func.func @transform_5(%arg0: i32) -> (i32, i32) {
    %c0_i32 = arith.constant 0 : i32
    %c0_i32_0 = arith.constant 0 : i32
    %c0_i32_1 = arith.constant 0 : i32
    return %c0_i32, %c0_i32_0 : i32, i32
  }
  func.func @transform_6(%arg0: i32) -> (i32, i32, i32) {
    %c0_i32 = arith.constant 0 : i32
    %c0_i32_0 = arith.constant 0 : i32
    %c0_i32_1 = arith.constant 0 : i32
    return %arg0, %c0_i32, %c0_i32_0 : i32, i32, i32
  }
}

</mosaic_0001>

<bundles_post_ra>
// kernel: efm_forward.1
= control target key start
LH: loop header
LB: loop body
LE: loop exit
PB: predicated region body
PF: predicated region fallthrough
CT: control target
= control target key end

     0   :  { %s2308_s21 = smov 0   ;;  %s3449_s0 = inlined_call_operand.vmem [shape: f32[2,64,128], index: 0, kind: input, shape index: {}]   ;;  %s3450_s1 = inlined_call_operand.vmem [shape: f32[2,64,128], index: 1, kind: input, shape index: {}]   ;;  %s3451_s2 = inlined_call_operand.vmem [shape: f32[1152,128], index: 2, kind: input, shape index: {}]   ;;  %s3452_s3 = inlined_call_operand.vmem [shape: f32[1,128], index: 3, kind: input, shape index: {}]   ;;  %s3453_s4 = inlined_call_operand.vmem [shape: f32[1,128], index: 4, kind: input, shape index: {}]   ;;  %s3454_s5 = inlined_call_operand.vmem [shape: f32[128,128], index: 5, kind: input, shape index: {}]   ;;  %s3455_s6 = inlined_call_operand.vmem [shape: f32[2,64,128], index: 6, kind: output, shape index: {}]  }
   0x1 LB: > { %s1650_s22 = sadd.s32 4294967295, %s2268_s21   ;;  %p1654_p0 = scmp.ge.s32.totalorder %s2268_s21, 1  ;;  %s2268_s21 = sphi %s2308_s21, %s16_s21  }
   0x2   : > { %p222_p1 = scmp.lt.s32.totalorder %s2268_s21, 3 }
   0x4   : > { %p223_p2 = pnand %p1654_p0, %p222_p1 }
   0x6   : > { %226 = sbr.rel (%p223_p2) target bundleno = 610 (0x262), region = 44 }
   0xd   : > { %v766_v0 = vld [vmem:[%s3451_s2 + $0x80] sm:$0xff]  ;;  %v767_v1 = vld [vmem:[%s3451_s2 + $0x88] sm:$0xff]  ;;  %v768_v11 = vld [vmem:[%s3451_s2 + $0x90] sm:$0xff]  ;;  %p2390_p3 = scmp.lt.s32.totalorder %s1650_s22, 1  ;;  %v304_v47 = vlaneseq }
   0xe   : > { %v798_v2 = vld [vmem:[%s3451_s2 + $0x180] sm:$0xff]  ;;  %v2063_v3 = vpack.c.bf16 %v767_v1, %v766_v0  ;;  %v799_v4 = vld [vmem:[%s3451_s2 + $0x188] sm:$0xff]  ;;  %v769_v13 = vld [vmem:[%s3451_s2 + $0x98] sm:$0xff] }
   0xf   : > { %v750_v5 = vld [vmem:[%s3451_s2] sm:$0xff]  ;;  %v751_v6 = vld [vmem:[%s3451_s2 + $0x8] sm:$0xff]  ;;  %v2095_v7 = vpack.c.bf16 %v799_v4, %v798_v2  ;;  %v800_v14 = vld [vmem:[%s3451_s2 + $0x190] sm:$0xff]  ;;  %v2067_v16 = vpack.c.bf16 %v769_v13, %v768_v11  ;;  %s3541_s22 = smov (!%p2390_p3, %s1650_s22), 1  ;;  %v2452_v61 = vshrl.u32 %v304_v47, 7 }
  0x10   : > { %v2065_v8 = vpack.c.bf16 %v751_v6, %v750_v5  ;;  %v782_v9 = vld [vmem:[%s3451_s2 + $0x100] sm:$0xff]  ;;  %v783_v10 = vld [vmem:[%s3451_s2 + $0x108] sm:$0xff]  ;;  %2064 = vmatprep.subr.bf16.mxu0 %v2063_v3  ;;  %v801_v15 = vld [vmem:[%s3451_s2 + $0x198] sm:$0xff]  ;;  %s2460_s24 = sshll.u32 %s3541_s22, 6 }
  0x11   : > { %v2097_v12 = vpack.c.bf16 %v783_v10, %v782_v9  ;;  %2096 = vmatprep.subr.bf16.mxu1 %v2095_v7  ;;  %v2099_v17 = vpack.c.bf16 %v801_v15, %v800_v14  ;;  %v752_v18 = vld [vmem:[%s3451_s2 + $0x10] sm:$0xff]  ;;  %v753_v19 = vld [vmem:[%s3451_s2 + $0x18] sm:$0xff]  ;;  %v770_v23 = vld [vmem:[%s3451_s2 + $0xa0] sm:$0xff]  ;;  %s2490_s18 = scalar_lea.vmem %s3449_s0, %s2460_s24  ;;  %v2494_v13 = vadd.s32 8, %v2452_v61  ;;  %s2515_s7 = scalar_lea.vmem %s3450_s1, %s2460_s24  ;;  %vm330_vm0 = vcmp.ge.s32.totalorder %v2452_v61, 4 }
  0x12   : > { %2066 = vmatpush3.bf16.msra.mxu0 %v2065_v8  ;;  %v784_v20 = vld [vmem:[%s3451_s2 + $0x110] sm:$0xff]  ;;  %v2069_v21 = vpack.c.bf16 %v753_v19, %v752_v18  ;;  %v785_v22 = vld [vmem:[%s3451_s2 + $0x118] sm:$0xff]  ;;  %v771_v24 = vld [vmem:[%s3451_s2 + $0xa8] sm:$0xff]  ;;  %vm3466_vm1 = vcmp.lt.s32.totalorder %v2452_v61, 4  ;;  %vm3464_vm2 = vcmp.lt.s32.totalorder %v2452_v61, 1  ;;  %vm3465_vm3 = vcmp.lt.s32.totalorder %v2452_v61, 5  ;;  %s271_s11 = scalar_lea.vmem %s3455_s6, %s2460_s24 }
  0x13   : > { %2098 = vmatpush3.bf16.msra.mxu1 %v2097_v12  ;;  %2068 = vmatprep.subr.bf16.mxu0 %v2067_v16  ;;  %v2101_v25 = vpack.c.bf16 %v785_v22, %v784_v20  ;;  %v2071_v26 = vpack.c.bf16 %v771_v24, %v770_v23  ;;  %v802_v27 = vld [vmem:[%s3451_s2 + $0x1a0] sm:$0xff]  ;;  %v803_v28 = vld [vmem:[%s3451_s2 + $0x1a8] sm:$0xff]  ;;  %v772_v35 = vld [vmem:[%s3451_s2 + $0xb0] sm:$0xff]  ;;  %v342_v12 = vand.u32 3, %v2452_v61  ;;  %vm3463_vm5 = vcmp.lt.s32.totalorder %v2452_v61, 3 }
  0x14   : > { %2100 = vmatprep.subr.bf16.mxu1 %v2099_v17  ;;  %v754_v29 = vld [vmem:[%s3451_s2 + $0x20] sm:$0xff]  ;;  %v2103_v30 = vpack.c.bf16 %v803_v28, %v802_v27  ;;  %v755_v31 = vld [vmem:[%s3451_s2 + $0x28] sm:$0xff]  ;;  %v773_v36 = vld [vmem:[%s3451_s2 + $0xb8] sm:$0xff] }
  0x15   : > { %v786_v32 = vld [vmem:[%s3451_s2 + $0x120] sm:$0xff]  ;;  %v787_v33 = vld [vmem:[%s3451_s2 + $0x128] sm:$0xff]  ;;  %v2073_v34 = vpack.c.bf16 %v755_v31, %v754_v29  ;;  %v804_v37 = vld [vmem:[%s3451_s2 + $0x1b0] sm:$0xff]  ;;  %v2075_v39 = vpack.c.bf16 %v773_v36, %v772_v35  ;;  %vm2556_vm4 = vcmp.ne.s32.totalorder %v342_v12, 0  ;;  %vm2577_vm6 = vcmp.ne.s32.totalorder %v342_v12, 3 }
  0x16   : > { %2070 = vmatpush3.bf16.msra.mxu0 %v2069_v21  ;;  %v2105_v38 = vpack.c.bf16 %v787_v33, %v786_v32  ;;  %v805_v40 = vld [vmem:[%s3451_s2 + $0x1b8] sm:$0xff]  ;;  %v756_v41 = vld [vmem:[%s3451_s2 + $0x30] sm:$0xff]  ;;  %v774_v46 = vld [vmem:[%s3451_s2 + $0xc0] sm:$0xff]  ;;  %v2535_v21 = vadd.s32 16, %v2452_v61  ;;  %v349_v33 = vand.u32 3, %v2494_v13 }
  0x17   : > { %2102 = vmatpush3.bf16.msra.mxu1 %v2101_v25  ;;  %2072 = vmatprep.subr.bf16.mxu0 %v2071_v26  ;;  %v757_v42 = vld [vmem:[%s3451_s2 + $0x38] sm:$0xff]  ;;  %v2107_v43 = vpack.c.bf16 %v805_v40, %v804_v37  ;;  %v788_v44 = vld [vmem:[%s3451_s2 + $0x130] sm:$0xff]  ;;  %v775_v48 = vld [vmem:[%s3451_s2 + $0xc8] sm:$0xff]  ;;  %v2582_v40 = vadd.s32 24, %v2452_v61 }
  0x18   : > { %2104 = vmatprep.subr.bf16.mxu1 %v2103_v30  ;;  %v789_v45 = vld [vmem:[%s3451_s2 + $0x138] sm:$0xff]  ;;  %v806_v49 = vld [vmem:[%s3451_s2 + $0x1c0] sm:$0xff]  ;;  %v807_v50 = vld [vmem:[%s3451_s2 + $0x1c8] sm:$0xff]  ;;  %v2077_v51 = vpack.c.bf16 %v757_v42, %v756_v41  ;;  %v2079_v53 = vpack.c.bf16 %v775_v48, %v774_v46  ;;  %vm2616_vm7 = vcmp.ne.s32.totalorder %v349_v33, 0  ;;  %vm2674_vm9 = vcmp.ne.s32.totalorder %v349_v33, 3 }
  0x19   : > { %v2109_v52 = vpack.c.bf16 %v789_v45, %v788_v44  ;;  %v758_v54 = vld [vmem:[%s3451_s2 + $0x40] sm:$0xff]  ;;  %v759_v55 = vld [vmem:[%s3451_s2 + $0x48] sm:$0xff]  ;;  %v2111_v57 = vpack.c.bf16 %v807_v50, %v806_v49  ;;  %v776_v59 = vld [vmem:[%s3451_s2 + $0xd0] sm:$0xff]  ;;  %v356_v44 = vand.u32 3, %v2535_v21  ;;  %v2595_v45 = vadd.s32 32, %v2452_v61 }
  0x1a   : > { %2074 = vmatpush3.bf16.msra.mxu0 %v2073_v34  ;;  %v790_v56 = vld [vmem:[%s3451_s2 + $0x140] sm:$0xff]  ;;  %v791_v58 = vld [vmem:[%s3451_s2 + $0x148] sm:$0xff]  ;;  %v777_v60 = vld [vmem:[%s3451_s2 + $0xd8] sm:$0xff]  ;;  %v2081_v0 = vpack.c.bf16 %v759_v55, %v758_v54 }
  0x1b   : > { %2106 = vmatpush3.bf16.msra.mxu1 %v2105_v38  ;;  %2076 = vmatprep.subr.bf16.mxu0 %v2075_v39  ;;  %v808_v62 = vld [vmem:[%s3451_s2 + $0x1d0] sm:$0xff]  ;;  %v809_v63 = vld [vmem:[%s3451_s2 + $0x1d8] sm:$0xff]  ;;  %v2113_v3 = vpack.c.bf16 %v791_v58, %v790_v56  ;;  %v2083_v4 = vpack.c.bf16 %v777_v60, %v776_v59  ;;  %v778_v7 = vld [vmem:[%s3451_s2 + $0xe0] sm:$0xff]  ;;  %vm2680_vm10 = vcmp.ne.s32.totalorder %v356_v44, 0  ;;  %vm2741_vm12 = vcmp.ne.s32.totalorder %v356_v44, 3 }
  0x1c   : > { %2108 = vmatprep.subr.bf16.mxu1 %v2107_v43  ;;  %v760_v1 = vld [vmem:[%s3451_s2 + $0x50] sm:$0xff]  ;;  %v761_v2 = vld [vmem:[%s3451_s2 + $0x58] sm:$0xff]  ;;  %v2115_v8 = vpack.c.bf16 %v809_v63, %v808_v62  ;;  %v779_v9 = vld [vmem:[%s3451_s2 + $0xe8] sm:$0xff] }
  0x1d   : > { %v792_v5 = vld [vmem:[%s3451_s2 + $0x150] sm:$0xff]  ;;  %v793_v6 = vld [vmem:[%s3451_s2 + $0x158] sm:$0xff]  ;;  %v810_v10 = vld [vmem:[%s3451_s2 + $0x1e0] sm:$0xff]  ;;  %v2085_v17 = vpack.c.bf16 %v761_v2, %v760_v1  ;;  %v2087_v23 = vpack.c.bf16 %v779_v9, %v778_v7 }
  0x1e   : > { %2078 = vmatpush3.bf16.msra.mxu0 %v2077_v51  ;;  %v811_v11 = vld [vmem:[%s3451_s2 + $0x1e8] sm:$0xff]  ;;  %v2499_v14 = vld [vmem:[%s3451_s2 + $0x60] sm:$0xff]  ;;  %v2525_v19 = vld [vmem:[%s3451_s2 + $0xf0] sm:$0xff]  ;;  %v2117_v22 = vpack.c.bf16 %v793_v6, %v792_v5 }
  0x1f   : > { %2110 = vmatpush3.bf16.msra.mxu1 %v2109_v52  ;;  %2080 = vmatprep.subr.bf16.mxu0 %v2079_v53  ;;  %v2504_v15 = vld [vmem:[%s3451_s2 + $0x68] sm:$0xff]  ;;  %v2509_v16 = vld [vmem:[%s3451_s2 + $0x160] sm:$0xff]  ;;  %v2530_v20 = vld [vmem:[%s3451_s2 + $0xf8] sm:$0xff]  ;;  %v2119_v28 = vpack.c.bf16 %v811_v11, %v810_v10  ;;  %v2609_v52 = vadd.s32 40, %v2452_v61 }
  0x20   : > { %2112 = vmatprep.subr.bf16.mxu1 %v2111_v57  ;;  %v2520_v18 = vld [vmem:[%s3451_s2 + $0x168] sm:$0xff]  ;;  %v2540_v24 = vld [vmem:[%s3451_s2 + $0x1f0] sm:$0xff]  ;;  %v813_v25 = vld [vmem:[%s3451_s2 + $0x1f8] sm:$0xff]  ;;  %v2089_v41 = vpack.c.bf16 %v2504_v15, %v2499_v14  ;;  %v2091_v46 = vpack.c.bf16 %v2530_v20, %v2525_v19  ;;  %v363_v19 = vand.u32 3, %v2582_v40 }
  0x21   : > { %v272_v26 = vld [vmem:[%s2490_s18] sm:$0xff]  ;;  %v279_v27 = vld [vmem:[%s2490_s18 + $0x38] sm:$0xff]  ;;  %v2552_v29 = vld [vmem:[%s3451_s2 + $0x70] sm:$0xff]  ;;  %v2121_v42 = vpack.c.bf16 %v2520_v18, %v2509_v16  ;;  %v2123_v53 = vpack.c.bf16 %v813_v25, %v2540_v24 }
  0x22   : > { %2082 = vmatpush3.bf16.msra.mxu0 %v2081_v0  ;;  %v280_v30 = vld [vmem:[%s2515_s7] sm:$0xff]  ;;  %v287_v31 = vld [vmem:[%s2515_s7 + $0x38] sm:$0xff]  ;;  %v2570_v35 = vld [vmem:[%s3451_s2 + $0x170] sm:$0xff]  ;;  %vm2780_vm13 = vcmp.ne.s32.totalorder %v363_v19, 0  ;;  %vm2843_vm14 = vcmp.ne.s32.totalorder %v363_v19, 3 }
  0x23   : > { %2114 = vmatpush3.bf16.msra.mxu1 %v2113_v3  ;;  %2084 = vmatprep.subr.bf16.mxu0 %v2083_v4  ;;  %v2565_v34 = vld [vmem:[%s3451_s2 + $0x78] sm:$0xff]  ;;  %v288_v37 = vmul.f32 %v280_v30, %v272_v26  ;;  %v295_v38 = vmul.f32 %v287_v31, %v279_v27  ;;  %v2591_v43 = vld [vmem:[%s3451_s2 + $0x280] sm:$0xff]  ;;  %v831_v49 = vld [vmem:[%s3451_s2 + $0x288] sm:$0xff] }
  0x24   : > { %2116 = vmatprep.subr.bf16.mxu1 %v2115_v8  ;;  %v2575_v36 = vld [vmem:[%s3451_s2 + $0x178] sm:$0xff]  ;;  %v273_v50 = vld [vmem:[%s2490_s18 + $0x8] sm:$0xff]  ;;  %v2093_v54 = vpack.c.bf16 %v2565_v34, %v2552_v29  ;;  %v862_v63 = vld [vmem:[%s3451_s2 + $0x380] sm:$0xff]  ;;  %v2127_v4 = vpack.c.bf16 %v831_v49, %v2591_v43 }
  0x25   : > { %v2599_v47 = vadd.f32 %v288_v37, %v272_v26  ;;  %v2601_v48 = vadd.f32 %v295_v38, %v279_v27  ;;  %v281_v51 = vld [vmem:[%s2515_s7 + $0x8] sm:$0xff]  ;;  %v2125_v55 = vpack.c.bf16 %v2575_v36, %v2570_v35  ;;  %v814_v5 = vld [vmem:[%s3451_s2 + $0x200] sm:$0xff]  ;;  %v274_v11 = vld [vmem:[%s2490_s18 + $0x10] sm:$0xff]  ;;  %v370_v26 = vand.u32 3, %v2595_v45 }
  0x26   : > { %2086 = vmatpush3.bf16.msra.mxu0 %v2085_v17  ;;  %v289_v56 = vmul.f32 %v281_v51, %v273_v50  ;;  %v863_v0 = vld [vmem:[%s3451_s2 + $0x388] sm:$0xff]  ;;  %v282_v12 = vld [vmem:[%s2515_s7 + $0x10] sm:$0xff]  ;;  %vm2662_vm8 = vmand %vm330_vm0, %vm2556_vm4 }
  0x27   : > { %2118 = vmatpush3.bf16.msra.mxu1 %v2117_v22  ;;  %2088 = vmatprep.subr.bf16.mxu0 %v2087_v23  ;;  %v474_v58 = vrot.slane %v2599_v47, 4  ;;  %v3459_v59 = vrot.slane %v2601_v48, 4  ;;  %v572_v60 = vrot.slane %v2599_v47, 7  ;;  %v3458_v62 = vrot.slane %v2601_v48, 7  ;;  %v815_v9 = vld [vmem:[%s3451_s2 + $0x208] sm:$0xff]  ;;  %v2669_v15 = vld [vmem:[%s3451_s2 + $0x300] sm:$0xff]  ;;  %vm2733_vm11 = vmand %vm330_vm0, %vm2577_vm6 }
  0x28   : > { %2120 = vmatprep.subr.bf16.mxu1 %v2119_v28  ;;  %v313_v1 = vrot.slane %v2599_v47, 3  ;;  %v3457_v2 = vrot.slane %v2601_v48, 3  ;;  %v515_v3 = vrot.slane %v2599_v47, 5  ;;  %v3456_v8 = vrot.slane %v2601_v48, 5  ;;  %v847_v16 = vld [vmem:[%s3451_s2 + $0x308] sm:$0xff]  ;;  %v832_v23 = vld [vmem:[%s3451_s2 + $0x290] sm:$0xff] }
  0x29   : > { %v2641_v6 = vsel %vm3466_vm1, %v3459_v59, %v474_v58  ;;  %v588_v7 = vsel %vm3464_vm2, %v3458_v62, %v572_v60  ;;  %v2651_v10 = vadd.f32 %v289_v56, %v273_v50  ;;  %v2159_v14 = vpack.c.bf16 %v863_v0, %v862_v63  ;;  %v833_v24 = vld [vmem:[%s3451_s2 + $0x298] sm:$0xff]  ;;  %v2698_v25 = vld [vmem:[%s3451_s2 + $0x210] sm:$0xff]  ;;  %v834_v56 = vld [vmem:[%s3451_s2 + $0x2a0] sm:$0xff] }
  0x2a   : > { %2090 = vmatpush3.bf16.msra.mxu0 %v2089_v41  ;;  %1661 = vmatprep.mubr.msk.f32.mxu0 %vm330_vm0, %v2641_v6  ;;  %v2707_v27 = vsel %vm3465_vm3, %v3457_v2, %v313_v1  ;;  %v2129_v28 = vpack.c.bf16 %v815_v9, %v814_v5  ;;  %v2713_v30 = vld [vmem:[%s3451_s2 + $0x218] sm:$0xff]  ;;  %v864_v31 = vld [vmem:[%s3451_s2 + $0x390] sm:$0xff]  ;;  %v290_v34 = vmul.f32 %v282_v12, %v274_v11  ;;  %v866_v12 = vld [vmem:[%s3451_s2 + $0x3a0] sm:$0xff]  ;;  %vm2917_vm15 = vcmp.ne.s32.totalorder %v370_v26, 0 }
  0x2b   : > { %2122 = vmatpush3.bf16.msra.mxu1 %v2121_v42  ;;  %2092 = vmatprep.subr.bf16.mxu0 %v2091_v46  ;;  %v475_v20 = vrot.slane %v2651_v10, 4  ;;  %v573_v22 = vrot.slane %v2651_v10, 7  ;;  %v314_v29 = vrot.slane %v2651_v10, 3  ;;  %v865_v33 = vld [vmem:[%s3451_s2 + $0x398] sm:$0xff]  ;;  %v2727_v35 = vsel %vm3463_vm5, %v3456_v8, %v515_v3  ;;  %v848_v21 = vld [vmem:[%s3451_s2 + $0x310] sm:$0xff]  ;;  %v1471_v17 = vld [vmem:[%s3454_s5] sm:$0xff] }
  0x2c   : > { %2124 = vmatprep.subr.bf16.mxu1 %v2123_v53  ;;  %1670 = vmatprep.mubr.msk.f32.mxu1 %vm2556_vm4, %v588_v7  ;;  %3485 = vst [vmem:[#allocation2_spill] sm:$0xff] %v2727_v35  ;;  %v2161_v37 = vpack.c.bf16 %v847_v16, %v2669_v15  ;;  %v516_v38 = vrot.slane %v2651_v10, 5  ;;  %v275_v42 = vld [vmem:[%s2490_s18 + $0x18] sm:$0xff]  ;;  %v3460_v46 = vand.u32 3, %v2609_v52  ;;  %v2131_v51 = vpack.c.bf16 %v833_v24, %v832_v23  ;;  %v2826_v23 = vld [vmem:[%s3451_s2 + $0x320] sm:$0xff]  ;;  %v2861_v36 = vld [vmem:[%s3451_s2 + $0x230] sm:$0xff] }
  0x2d   : > { %v283_v43 = vld [vmem:[%s2515_s7 + $0x18] sm:$0xff]  ;;  %v2750_v49 = vsel %vm3466_vm1, %v474_v58, %v475_v20  ;;  %v587_v50 = vsel %vm3464_vm2, %v572_v60, %v573_v22  ;;  %v2754_v53 = vadd.f32 %v290_v34, %v274_v11  ;;  %v835_v58 = vld [vmem:[%s3451_s2 + $0x2a8] sm:$0xff]  ;;  %v2776_v60 = vld [vmem:[%s3451_s2 + $0x220] sm:$0xff]  ;;  %vm2934_vm0 = vcmp.ne.s32.totalorder %v370_v26, 3 }
  0x2e   : > { %2094 = vmatpush3.bf16.msra.mxu0 %v2093_v54  ;;  %v849_v44 = vld [vmem:[%s3451_s2 + $0x318] sm:$0xff]  ;;  %v2133_v54 = vpack.c.bf16 %v2713_v30, %v2698_v25  ;;  %v291_v63 = vmul.f32 %v283_v43, %v275_v42  ;;  %v2801_v11 = vld [vmem:[%s3451_s2 + $0x228] sm:$0xff]  ;;  %v2818_v13 = vsel %vm3463_vm5, %v515_v3, %v516_v38  ;;  %v276_v24 = vld [vmem:[%s2490_s18 + $0x20] sm:$0xff]  ;;  %v2135_v30 = vpack.c.bf16 %v835_v58, %v834_v56 }
  0x2f   : > { %2126 = vmatpush3.bf16.msra.mxu1 %v2125_v55  ;;  %2128 = vmatprep.subr.bf16.mxu0 %v2127_v4  ;;  %v2163_v55 = vpack.c.bf16 %v865_v33, %v864_v31  ;;  %v2793_v4 = vsel %vm3465_vm3, %v313_v1, %v314_v29  ;;  %v476_v5 = vrot.slane %v2754_v53, 4  ;;  %v574_v7 = vrot.slane %v2754_v53, 7  ;;  %v867_v1 = vld [vmem:[%s3451_s2 + $0x3a8] sm:$0xff]  ;;  %v284_v25 = vld [vmem:[%s2515_s7 + $0x20] sm:$0xff]  ;;  %v825_v2 = vld [vmem:[%s3451_s2 + $0x258] sm:$0xff] }
  0x30   : > { %2160 = vmatprep.subr.bf16.mxu1 %v2159_v14  ;;  %v315_v9 = vrot.slane %v2754_v53, 3  ;;  %v2165_v14 = vpack.c.bf16 %v849_v44, %v848_v21  ;;  %v517_v15 = vrot.slane %v2754_v53, 5  ;;  %v2821_v16 = vadd.f32 %v291_v63, %v275_v42  ;;  %v2839_v31 = vld [vmem:[%s3451_s2 + $0x328] sm:$0xff]  ;;  %v868_v42 = vld [vmem:[%s3451_s2 + $0x3b0] sm:$0xff]  ;;  %v869_v44 = vld [vmem:[%s3451_s2 + $0x3b8] sm:$0xff] }
  0x31   : > { %1662 = vmatmul.mubr.msk.f32.vlgmr.msra.gmra.mrb[0].mxu0 %vm2662_vm8, %v2707_v27  ;;  %v586_v3 = vsel %vm3464_vm2, %v573_v22, %v574_v7  ;;  %v837_v22 = vld [vmem:[%s3451_s2 + $0x2b8] sm:$0xff]  ;;  %v2167_v40 = vpack.c.bf16 %v867_v1, %v866_v12  ;;  %v2872_v43 = vadd.s32 48, %v2452_v61  ;;  %v277_v56 = vld [vmem:[%s2490_s18 + $0x28] sm:$0xff]  ;;  %v2169_v58 = vpack.c.bf16 %v2839_v31, %v2826_v23  ;;  %v872_v62 = vld [vmem:[%s3451_s2 + $0x3d0] sm:$0xff] }
  0x32   : > { %1671 = vmatmul.mubr.msk.f32.vlgmr.msra.gmra.mrb[0].mxu1 %vm2733_vm11, %v2727_v35  ;;  %2130 = vmatpush3.bf16.msra.mxu0 %v2129_v28  ;;  %v2832_v28 = vsel %vm3466_vm1, %v475_v20, %v476_v5  ;;  %v836_v20 = vld [vmem:[%s3451_s2 + $0x2b0] sm:$0xff]  ;;  %v477_v19 = vrot.slane %v2821_v16, 4  ;;  %v575_v34 = vrot.slane %v2821_v16, 7  ;;  %v316_v21 = vrot.slane %v2821_v16, 3 }
  0x33   : > { %963 = vmatprep.mubr.f32.mxu0 %v2750_v49  ;;  %1672 = vmatprep.mubr.msk.f32.mxu1 %vm2616_vm7, %v587_v50  ;;  %v2883_v50 = vsel %vm3465_vm3, %v314_v29, %v315_v9  ;;  %v2902_v29 = vsel %vm3463_vm5, %v516_v38, %v517_v15  ;;  %v2139_v63 = vpack.c.bf16 %v837_v22, %v836_v20  ;;  %vm3001_vm8 = vcmp.ne.s32.totalorder %v3460_v46, 0  ;;  %v3539_v39 = vld [vmem:[#allocation2_spill] sm:$0xff]  ;;  %v1473_v33 = vld [vmem:[%s3454_s5 + $0x10] sm:$0xff] }
  0x34   : > { %2162 = vmatpush3.bf16.msra.mxu1 %v2161_v37  ;;  %2132 = vmatprep.subr.bf16.mxu0 %v2131_v51  ;;  %v2866_v37 = vld [vmem:[%s3451_s2 + $0x238] sm:$0xff]  ;;  %v2137_v51 = vpack.c.bf16 %v2801_v11, %v2776_v60  ;;  %3494 = vst [vmem:[#allocation3_spill] sm:$0xff] %v2902_v29  ;;  %v518_v60 = vrot.slane %v2821_v16, 5  ;;  %v2909_v11 = vsel %vm3466_vm1, %v476_v5, %v477_v19 }
  0x35   : > { %1663 = vmatmul.mubr.msk.f32.gmra.mrb[2].mxu0 %vm2616_vm7, %v2793_v4  ;;  %2164 = vmatprep.subr.bf16.mxu1 %v2163_v55  ;;  %v292_v55 = vmul.f32 %v284_v25, %v276_v24  ;;  %v585_v12 = vsel %vm3464_vm2, %v574_v7, %v575_v34  ;;  %v853_v5 = vld [vmem:[%s3451_s2 + $0x338] sm:$0xff]  ;;  %v2141_v7 = vpack.c.bf16 %v2866_v37, %v2861_v36  ;;  %v838_v25 = vld [vmem:[%s3451_s2 + $0x2c0] sm:$0xff]  ;;  %v871_v37 = vld [vmem:[%s3451_s2 + $0x3c8] sm:$0xff] }
  0x36   : > { %1673 = vmatmul.mubr.msk.f32.gmra.mrb[2].mxu1 %vm2674_vm9, %v2818_v13  ;;  %2134 = vmatpush3.bf16.msra.mxu0 %v2133_v54  ;;  %v285_v54 = vld [vmem:[%s2515_s7 + $0x28] sm:$0xff]  ;;  %v2171_v23 = vpack.c.bf16 %v869_v44, %v868_v42  ;;  %v2958_v45 = vsel %vm3465_vm3, %v315_v9, %v316_v21  ;;  %v870_v36 = vld [vmem:[%s3451_s2 + $0x3c0] sm:$0xff]  ;;  %v2981_v9 = vsel %vm3463_vm5, %v517_v15, %v518_v60 }
  0x37   : > { %968 = vmatprep.mubr.f32.mxu0 %v2832_v28  ;;  %1674 = vmatprep.mubr.msk.f32.mxu1 %vm2680_vm10, %v586_v3  ;;  %v2913_v1 = vadd.f32 %v292_v55, %v276_v24  ;;  %v839_v3 = vld [vmem:[%s3451_s2 + $0x2c8] sm:$0xff]  ;;  %v293_v31 = vmul.f32 %v285_v54, %v277_v56  ;;  %3499 = vst [vmem:[#allocation4_spill] sm:$0xff] %v2981_v9  ;;  %v2989_v55 = vld [vmem:[%s3451_s2 + $0x340] sm:$0xff]  ;;  %v278_v54 = vld [vmem:[%s2490_s18 + $0x30] sm:$0xff] }
  0x38   : > { %2166 = vmatpush3.bf16.msra.mxu1 %v2165_v14  ;;  %2136 = vmatprep.subr.bf16.mxu0 %v2135_v30  ;;  %v852_v14 = vld [vmem:[%s3451_s2 + $0x330] sm:$0xff]  ;;  %v2947_v30 = vld [vmem:[%s3451_s2 + $0x240] sm:$0xff]  ;;  %v1474_v24 = vld [vmem:[%s3454_s5 + $0x18] sm:$0xff] }
  0x39   : > { %1664 = vmatmul.mubr.msk.f32.gmra.mrb[4].mxu0 %vm2680_vm10, %v2883_v50  ;;  %2168 = vmatprep.subr.bf16.mxu1 %v2167_v40  ;;  %v478_v26 = vrot.slane %v2913_v1, 4  ;;  %v576_v20 = vrot.slane %v2913_v1, 7  ;;  %v317_v22 = vrot.slane %v2913_v1, 3  ;;  %v823_v40 = vld [vmem:[%s3451_s2 + $0x248] sm:$0xff]  ;;  %v2173_v42 = vpack.c.bf16 %v853_v5, %v852_v14 }
  0x3a   : > { %1675 = vmatmul.mubr.msk.f32.gmra.mrb[4].mxu1 %vm2741_vm12, %v2902_v29  ;;  %2138 = vmatpush3.bf16.msra.mxu0 %v2137_v51  ;;  %v519_v51 = vrot.slane %v2913_v1, 5  ;;  %v2984_v44 = vadd.f32 %v293_v31, %v277_v56  ;;  %v2143_v14 = vpack.c.bf16 %v839_v3, %v838_v25  ;;  %v3500_v56 = vmov 0  ;;  %v855_v5 = vld [vmem:[%s3451_s2 + $0x348] sm:$0xff]  ;;  %v824_v3 = vld [vmem:[%s3451_s2 + $0x250] sm:$0xff] }
  0x3b   : > { %973 = vmatprep.mubr.f32.mxu0 %v2909_v11  ;;  %1676 = vmatprep.mubr.msk.f32.mxu1 %vm2780_vm13, %v585_v12  ;;  %v286_v12 = vld [vmem:[%s2515_s7 + $0x30] sm:$0xff]  ;;  %v2995_v8 = vsel %vm3466_vm1, %v477_v19, %v478_v26  ;;  %v584_v15 = vsel %vm3464_vm2, %v575_v34, %v576_v20  ;;  %v3501_v56 = vsel %vm3001_vm8, 4294967295, %v3500_v56  ;;  %v841_v19 = vld [vmem:[%s3451_s2 + $0x2d8] sm:$0xff]  ;;  %v2175_v34 = vpack.c.bf16 %v871_v37, %v870_v36 }
  0x3c   : > { %2170 = vmatpush3.bf16.msra.mxu1 %v2169_v58  ;;  %2140 = vmatprep.subr.bf16.mxu0 %v2139_v63  ;;  %v840_v58 = vld [vmem:[%s3451_s2 + $0x2d0] sm:$0xff]  ;;  %v479_v63 = vrot.slane %v2984_v44, 4  ;;  %v577_v25 = vrot.slane %v2984_v44, 7  ;;  %v3023_v31 = vadd.s32 56, %v2452_v61  ;;  %v2145_v36 = vpack.c.bf16 %v823_v40, %v2947_v30 }
  0x3d   : > { %1665 = vmatmul.mubr.msk.f32.gmra.mrb[6].mxu0 %vm2780_vm13, %v2958_v45  ;;  %2172 = vmatprep.subr.bf16.mxu1 %v2171_v23  ;;  %v3032_v23 = vsel %vm3465_vm3, %v316_v21, %v317_v22  ;;  %v318_v37 = vrot.slane %v2984_v44, 3  ;;  %v294_v59 = vmul.f32 %v286_v12, %v278_v54  ;;  %v3052_v21 = vsel %vm3463_vm5, %v518_v60, %v519_v51  ;;  %v856_v60 = vld [vmem:[%s3451_s2 + $0x350] sm:$0xff] }
  0x3e   : > { %1677 = vmatmul.mubr.msk.f32.gmra.mrb[6].mxu1 %vm2843_vm14, %v2981_v9  ;;  %2142 = vmatpush3.bf16.msra.mxu0 %v2141_v7  ;;  %v873_v7 = vld [vmem:[%s3451_s2 + $0x3d8] sm:$0xff]  ;;  %3502 = vst [vmem:[#allocation5_spill] sm:$0xff] %v3052_v21  ;;  %v2177_v30 = vpack.c.bf16 %v855_v5, %v2989_v55  ;;  %v520_v40 = vrot.slane %v2984_v44, 5  ;;  %v2147_v46 = vpack.c.bf16 %v841_v19, %v840_v58  ;;  %v384_v9 = vand.u32 3, %v2872_v43  ;;  %v842_v55 = vld [vmem:[%s3451_s2 + $0x2e0] sm:$0xff]  ;;  %v875_v58 = vld [vmem:[%s3451_s2 + $0x3e8] sm:$0xff] }
  0x3f   : > { %978 = vmatprep.mubr.f32.mxu0 %v2995_v8  ;;  %1678 = vmatprep.mubr.msk.f32.mxu1 %vm2917_vm15, %v584_v15  ;;  %v3058_v12 = vsel %vm3466_vm1, %v478_v26, %v479_v63  ;;  %v583_v15 = vsel %vm3464_vm2, %v576_v20, %v577_v25  ;;  %v3062_v35 = vadd.f32 %v294_v59, %v278_v54  ;;  %v3503_v26 = vand.u32 3, %v2609_v52  ;;  %v843_v54 = vld [vmem:[%s3451_s2 + $0x2e8] sm:$0xff]  ;;  %v874_v5 = vld [vmem:[%s3451_s2 + $0x3e0] sm:$0xff] }
  0x40   : > { %2174 = vmatpush3.bf16.msra.mxu1 %v2173_v42  ;;  %2144 = vmatprep.subr.bf16.mxu0 %v2143_v14  ;;  %v857_v42 = vld [vmem:[%s3451_s2 + $0x358] sm:$0xff]  ;;  %v2149_v43 = vpack.c.bf16 %v825_v2, %v824_v3  ;;  %v2179_v20 = vpack.c.bf16 %v873_v7, %v872_v62  ;;  %v3091_v52 = vsel %vm3465_vm3, %v317_v22, %v318_v37  ;;  %v826_v3 = vld [vmem:[%s3451_s2 + $0x260] sm:$0xff]  ;;  %v391_v7 = vand.u32 3, %v3023_v31 }
  0x41   : > { %1666 = vmatmul.mubr.msk.f32.gmra.mrb[8].mxu0 %vm2917_vm15, %v3032_v23  ;;  %2176 = vmatprep.subr.bf16.mxu1 %v2175_v34  ;;  %vm3076_vm11 = vcmp.ne.s32.totalorder %v3503_v26, 3  ;;  %v480_v2 = vrot.slane %v3062_v35, 4  ;;  %v578_v62 = vrot.slane %v3062_v35, 7  ;;  %v319_v14 = vrot.slane %v3062_v35, 3  ;;  %v858_v26 = vld [vmem:[%s3451_s2 + $0x360] sm:$0xff] }
  0x42   : > { %1679 = vmatmul.mubr.msk.f32.gmra.mrb[8].mxu1 %vm2934_vm0, %v3052_v21  ;;  %2146 = vmatpush3.bf16.msra.mxu0 %v2145_v36  ;;  %v3107_v22 = vsel %vm3463_vm5, %v519_v51, %v520_v40  ;;  %v2181_v19 = vpack.c.bf16 %v857_v42, %v856_v60  ;;  %v521_v34 = vrot.slane %v3062_v35, 5  ;;  %v827_v36 = vld [vmem:[%s3451_s2 + $0x268] sm:$0xff]  ;;  %vm3121_vm5 = vcmp.ne.s32.totalorder %v384_v9, 0 }
  0x43   : > { %983 = vmatprep.mubr.f32.mxu0 %v3058_v12  ;;  %1680 = vmatprep.mubr.msk.f32.mxu1 %vm3001_vm8, %v583_v15  ;;  %3506 = vst [vmem:[#allocation6_spill] sm:$0xff] %v3107_v22  ;;  %v3119_v15 = vsel %vm3466_vm1, %v479_v63, %v480_v2  ;;  %v3507_v51 = vmov 0  ;;  %v582_v60 = vsel %vm3464_vm2, %v577_v25, %v578_v62  ;;  %v845_v25 = vld [vmem:[%s3451_s2 + $0x2f8] sm:$0xff]  ;;  %vm3149_vm2 = vcmp.ne.s32.totalorder %v384_v9, 3 }
  0x44   : > { %2178 = vmatpush3.bf16.msra.mxu1 %v2177_v30  ;;  %2148 = vmatprep.subr.bf16.mxu0 %v2147_v46  ;;  %v3508_v51 = vsel %vm3121_vm5, 4294967295, %v3507_v51  ;;  %v2151_v42 = vpack.c.bf16 %v843_v54, %v842_v55  ;;  %v859_v46 = vld [vmem:[%s3451_s2 + $0x368] sm:$0xff]  ;;  %v2183_v63 = vpack.c.bf16 %v875_v58, %v874_v5  ;;  %v844_v30 = vld [vmem:[%s3451_s2 + $0x2f0] sm:$0xff]  ;;  %v3147_v55 = vsel %vm3465_vm3, %v318_v37, %v319_v14  ;;  %v877_v58 = vld [vmem:[%s3451_s2 + $0x3f8] sm:$0xff] }
  0x45   : > { %1667 = vmatmul.mubr.msk.f32.gmra.mrb[10].mxu0 %vm3001_vm8, %v3091_v52  ;;  %2180 = vmatprep.subr.bf16.mxu1 %v2179_v20  ;;  %v2153_v54 = vpack.c.bf16 %v827_v36, %v826_v3  ;;  %v876_v5 = vld [vmem:[%s3451_s2 + $0x3f0] sm:$0xff]  ;;  %vm3511_vm3 = vcmp.lt.s32.totalorder %v2452_v61, 3  ;;  %vm3166_vm1 = vcmp.ne.s32.totalorder %v391_v7, 0  ;;  %v829_v36 = vld [vmem:[%s3451_s2 + $0x278] sm:$0xff]  ;;  %vm3517_vm8 = vcmp.lt.s32.totalorder %v2452_v61, 1  ;;  %v1480_v37 = vld [vmem:[%s3454_s5 + $0x48] sm:$0xff] }
  0x46   : > { %1681 = vmatmul.mubr.msk.f32.gmra.mrb[10].mxu1 %vm3076_vm11, %v3107_v22  ;;  %2150 = vmatpush3.bf16.msra.mxu0 %v2149_v43  ;;  %v3164_v9 = vsel %vm3511_vm3, %v520_v40, %v521_v34  ;;  %v2185_v43 = vpack.c.bf16 %v859_v46, %v858_v26  ;;  %v828_v3 = vld [vmem:[%s3451_s2 + $0x270] sm:$0xff]  ;;  %v3514_v40 = vrot.slane %v2601_v48, 4  ;;  %vm3515_vm3 = vcmp.lt.s32.totalorder %v2452_v61, 4  ;;  %v878_v22 = vld [vmem:[%s3451_s2 + $0x400] sm:$0xff] }
  0x47   : > { %988 = vmatprep.mubr.f32.mxu0 %v3119_v15  ;;  %1682 = vmatprep.mubr.msk.f32.mxu1 %vm3121_vm5, %v582_v60  ;;  %v3516_v26 = vrot.slane %v2601_v48, 7  ;;  %v2155_v21 = vpack.c.bf16 %v845_v25, %v844_v30  ;;  %v614_v29 = vrot.slane %v2651_v10, 1  ;;  %v3518_v30 = vrot.slane %v2601_v48, 3 }
  0x48   : > { %2182 = vmatpush3.bf16.msra.mxu1 %v2181_v19  ;;  %2152 = vmatprep.subr.bf16.mxu0 %v2151_v42  ;;  %v3181_v60 = vsel %vm3515_vm3, %v480_v2, %v3514_v40  ;;  %v879_v19 = vld [vmem:[%s3451_s2 + $0x408] sm:$0xff]  ;;  %v2187_v2 = vpack.c.bf16 %v877_v58, %v876_v5  ;;  %v861_v42 = vld [vmem:[%s3451_s2 + $0x378] sm:$0xff]  ;;  %v2157_v25 = vpack.c.bf16 %v829_v36, %v828_v3  ;;  %v3520_v5 = vrot.slane %v2601_v48, 5 }
  0x49   : > { %v581_v46 = vsel %vm3517_vm8, %v578_v62, %v3516_v26  ;;  %1668 = vmatmul.mubr.msk.f32.gmra.mrb[12].mxu0 %vm3121_vm5, %v3147_v55  ;;  %2184 = vmatprep.subr.bf16.mxu1 %v2183_v63  ;;  %v860_v62 = vld [vmem:[%s3451_s2 + $0x370] sm:$0xff]  ;;  %vm3519_vm8 = vcmp.lt.s32.totalorder %v2452_v61, 5  ;;  %vm3521_vm3 = vcmp.lt.s32.totalorder %v2452_v61, 3  ;;  %vm3222_vm5 = vcmp.ne.s32.totalorder %v391_v7, 3  ;;  %v881_v7 = vld [vmem:[%s3451_s2 + $0x418] sm:$0xff] }
  0x4a   : > { %1683 = vmatmul.mubr.msk.f32.gmra.mrb[12].mxu1 %vm3149_vm2, %v3164_v9  ;;  %2154 = vmatpush3.bf16.msra.mxu0 %v2153_v54  ;;  %v3211_v63 = vsel %vm3519_vm8, %v319_v14, %v3518_v30  ;;  %v3220_v58 = vsel %vm3521_vm3, %v521_v34, %v3520_v5  ;;  %v2191_v40 = vpack.c.bf16 %v879_v19, %v878_v22  ;;  %v615_v14 = vrot.slane %v2754_v53, 1  ;;  %v880_v34 = vld [vmem:[%s3451_s2 + $0x410] sm:$0xff]  ;;  %v883_v19 = vld [vmem:[%s3451_s2 + $0x428] sm:$0xff] }
  0x4b   : > { %993 = vmatprep.mubr.f32.mxu0 %v3181_v60  ;;  %1684 = vmatprep.mubr.msk.f32.mxu1 %vm3166_vm1, %v581_v46  ;;  %v3524_v3 = vrot.slane %v2599_v47, 1  ;;  %vm3525_vm8 = vcmp.lt.s32.totalorder %v2452_v61, 7  ;;  %v2189_v26 = vpack.c.bf16 %v861_v42, %v860_v62  ;;  %v2195_v22 = vpack.c.bf16 %v881_v7, %v880_v34  ;;  %v882_v46 = vld [vmem:[%s3451_s2 + $0x420] sm:$0xff]  ;;  %v884_v62 = vld [vmem:[%s3451_s2 + $0x430] sm:$0xff]  ;;  %v885_v42 = vld [vmem:[%s3451_s2 + $0x438] sm:$0xff] }
  0x4c   : > { %2186 = vmatpush3.bf16.msra.mxu1 %v2185_v43  ;;  %2156 = vmatprep.subr.bf16.mxu0 %v2155_v21  ;;  %vm3526_vm3 = vmmov %vm3525_vm8  ;;  %v616_v43 = vrot.slane %v2821_v16, 1  ;;  %v887_v30 = vld [vmem:[%s3451_s2 + $0x448] sm:$0xff]  ;;  %v2272_v34 = vmov 0.0  }
  0x4d   : > { %v628_v36 = vsel %vm3525_vm8, %v3524_v3, %v614_v29  ;;  %1669 = vmatmul.mubr.msk.f32.gmra.mrb[14].mxu0 %vm3166_vm1, %v3211_v63  ;;  %2188 = vmatprep.subr.bf16.mxu1 %v2187_v2  ;;  %v627_v21 = vsel %vm3526_vm3, %v614_v29, %v615_v14  ;;  %vm3527_vm8 = vmmov %vm3526_vm3  ;;  %v2199_v29 = vpack.c.bf16 %v883_v19, %v882_v46  ;;  %v617_v2 = vrot.slane %v2913_v1, 1  ;;  %v891_v5 = vld [vmem:[%s3451_s2 + $0x468] sm:$0xff] }
  0x4e   : > { %1685 = vmatmul.mubr.msk.f32.gmra.mrb[14].mxu1 %vm3222_vm5, %v3220_v58  ;;  %2158 = vmatpush3.bf16.msra.mxu0 %v2157_v25  ;;  %v889_v25 = vld [vmem:[%s3451_s2 + $0x458] sm:$0xff]  ;;  %v3533_v38 = vmov %v3524_v3 }
  0x4f   : > { %1686 = vmatprep.mubr.msk.f32.mxu0 %vm2577_vm6, %v628_v36  ;;  %2192 = vmatprep.subr.bf16.mxu0 %v2191_v40  ;;  %v1485_v36 = vld [vmem:[%s3454_s5 + $0x70] sm:$0xff] }
  0x50   : > { %2190 = vmatpush3.bf16.msra.mxu1 %v2189_v26  ;;  %1273 = vmatprep.mubr.f32.mxu1 %v2750_v49  ;;  %v626_v49 = vsel %vm3527_vm8, %v615_v14, %v616_v43  ;;  %vm661_vm8 = vcmp.lt.s32.totalorder %v3023_v31, 60  ;;  %v1476_v31 = vld [vmem:[%s3454_s5 + $0x28] sm:$0xff]  ;;  %v1486_v26 = vld [vmem:[%s3454_s5 + $0x78] sm:$0xff] }
  0x51   : > { %1169 = vmatmul.mubr.f32.vlgmr.msra.gmra.mrb[16].mxu0 %v2599_v47  ;;  %v3535_v47 = vld [vmem:[#allocation3_spill] sm:$0xff]  ;;  %v2245_v7 = vpack.c.bf16 %v1486_v26, %v1485_v36 }
  0x52   : > { %2194 = vmatpush3.bf16.msra.mxu0 %v2191_v40  ;;  %1687 = vmatprep.mubr.msk.f32.mxu0 %vm2674_vm9, %v627_v21  ;;  %v1483_v40 = vld [vmem:[%s3454_s5 + $0x60] sm:$0xff]  ;;  %v1484_v14 = vld [vmem:[%s3454_s5 + $0x68] sm:$0xff] }
  0x53   : > { %1694 = vmatmul.mubr.msk.f32.vlgmr.msra.gmra.mrb[16].mxu1 %vm2556_vm4, %v2793_v4  ;;  %2196 = vmatprep.subr.bf16.mxu0 %v2195_v22  ;;  %vm3528_vm4 = vmmov %vm3526_vm3  ;;  %v2203_v4 = vpack.c.bf16 %v885_v42, %v884_v62  ;;  %v2242_v3 = vpack.c.bf16 %v1484_v14, %v1483_v40 }
  0x54   : > { %1278 = vmatprep.mubr.f32.mxu1 %v2832_v28  ;;  %v625_v32 = vsel %vm3528_vm4, %v616_v43, %v617_v2  ;;  %v618_v28 = vrot.slane %v2984_v44, 1  ;;  %vm3534_vm4 = vnez %v3508_v51  ;;  %v1477_v51 = vld [vmem:[%s3454_s5 + $0x30] sm:$0xff] }
  0x55   : > { %1174 = vmatmul.mubr.f32.gmra.mrb[18].mxu0 %v2651_v10  ;;  %v886_v10 = vld [vmem:[%s3451_s2 + $0x440] sm:$0xff] }
  0x56   : > { %2198 = vmatpush3.bf16.msra.mxu0 %v2195_v22  ;;  %1688 = vmatprep.mubr.msk.f32.mxu0 %vm2741_vm12, %v626_v49 }
  0x57   : > { %1695 = vmatmul.mubr.msk.f32.gmra.mrb[18].mxu1 %vm2616_vm7, %v2883_v50  ;;  %2200 = vmatprep.subr.bf16.mxu0 %v2199_v29  ;;  %vm3529_vm7 = vmmov %vm3526_vm3  ;;  %v2207_v50 = vpack.c.bf16 %v887_v30, %v886_v10 }
  0x58   : > { %1283 = vmatprep.mubr.f32.mxu1 %v2909_v11  ;;  %v624_v57 = vsel %vm3529_vm7, %v617_v2, %v618_v28  ;;  %v619_v11 = vrot.slane %v3062_v35, 1  ;;  %vm669_vm7 = vmand %vm661_vm8, %vm3166_vm1 }
  0x59   : > { %1179 = vmatmul.mubr.f32.gmra.mrb[20].mxu0 %v2754_v53  ;;  %v888_v53 = vld [vmem:[%s3451_s2 + $0x450] sm:$0xff]  ;;  %vm725_vm1 = vmand %vm661_vm8, %vm3222_vm5 }
  0x5a   : > { %2202 = vmatpush3.bf16.msra.mxu0 %v2199_v29  ;;  %1689 = vmatprep.mubr.msk.f32.mxu0 %vm2843_vm14, %v625_v32  ;;  %v2211_v18 = vpack.c.bf16 %v889_v25, %v888_v53 }
  0x5b   : > { %1696 = vmatmul.mubr.msk.f32.gmra.mrb[20].mxu1 %vm2680_vm10, %v2958_v45  ;;  %2204 = vmatprep.subr.bf16.mxu0 %v2203_v4  ;;  %vm3530_vm10 = vmmov %vm3526_vm3  ;;  %v620_v45 = vrot.slane %v2601_v48, 1 }
  0x5c   : > { %1288 = vmatprep.mubr.f32.mxu1 %v2995_v8  ;;  %v623_v8 = vsel %vm3530_vm10, %v618_v28, %v619_v11 }
  0x5d   : > { %1184 = vmatmul.mubr.f32.gmra.mrb[22].mxu0 %v2821_v16  ;;  %v890_v16 = vld [vmem:[%s3451_s2 + $0x460] sm:$0xff] }
  0x5e   : > { %2206 = vmatpush3.bf16.msra.mxu0 %v2203_v4  ;;  %1690 = vmatprep.mubr.msk.f32.mxu0 %vm2934_vm0, %v624_v57 }
  0x5f   : > { %1697 = vmatmul.mubr.msk.f32.gmra.mrb[22].mxu1 %vm2780_vm13, %v3032_v23  ;;  %2208 = vmatprep.subr.bf16.mxu0 %v2207_v50  ;;  %vm3531_vm13 = vmmov %vm3526_vm3  ;;  %v2215_v23 = vpack.c.bf16 %v891_v5, %v890_v16 }
  0x60   : > { %1293 = vmatprep.mubr.f32.mxu1 %v3058_v12  ;;  %v622_v0 = vsel %vm3531_vm13, %v619_v11, %v620_v45  ;;  %v892_v12 = vld [vmem:[%s3451_s2 + $0x470] sm:$0xff] }
  0x61   : > { %1189 = vmatmul.mubr.f32.gmra.mrb[24].mxu0 %v2913_v1  ;;  %v893_v1 = vld [vmem:[%s3451_s2 + $0x478] sm:$0xff] }
  0x62   : > { %2210 = vmatpush3.bf16.msra.mxu0 %v2207_v50  ;;  %1691 = vmatprep.mubr.msk.f32.mxu0 %vm3076_vm11, %v623_v8 }
  0x63   : > { %1698 = vmatmul.mubr.msk.f32.gmra.mrb[24].mxu1 %vm2917_vm15, %v3091_v52  ;;  %2212 = vmatprep.subr.bf16.mxu0 %v2211_v18  ;;  %vm3532_vm15 = vnez %v3501_v56  ;;  %v629_v52 = vsel %vm3526_vm3, %v620_v45, %v3533_v38  ;;  %v1475_v56 = vld [vmem:[%s3454_s5 + $0x20] sm:$0xff] }
  0x64   : > { %1298 = vmatprep.mubr.f32.mxu1 %v3119_v15  ;;  %v2219_v15 = vpack.c.bf16 %v893_v1, %v892_v12  ;;  %v2230_v59 = vpack.c.bf16 %v1476_v31, %v1475_v56 }
  0x65   : > { %1194 = vmatmul.mubr.f32.gmra.mrb[26].mxu0 %v2984_v44  ;;  %v2227_v44 = vpack.c.bf16 %v1474_v24, %v1473_v33 }
  0x66   : > { %2214 = vmatpush3.bf16.msra.mxu0 %v2211_v18  ;;  %1692 = vmatprep.mubr.msk.f32.mxu0 %vm3149_vm2, %v622_v0 }
  0x67   : > { %1699 = vmatmul.mubr.msk.f32.gmra.mrb[26].mxu1 %vm3532_vm15, %v3147_v55  ;;  %2216 = vmatprep.subr.bf16.mxu0 %v2215_v23  ;;  %v1478_v55 = vld [vmem:[%s3454_s5 + $0x38] sm:$0xff] }
  0x68   : > { %1303 = vmatprep.mubr.f32.mxu1 %v3181_v60  ;;  %v2233_v20 = vpack.c.bf16 %v1478_v55, %v1477_v51 }
  0x69   : > { %1199 = vmatmul.mubr.f32.gmra.mrb[28].mxu0 %v3062_v35  ;;  %v3536_v35 = vld [vmem:[#allocation4_spill] sm:$0xff] }
  0x6a   : > { %2218 = vmatpush3.bf16.msra.mxu0 %v2215_v23  ;;  %1693 = vmatprep.mubr.msk.f32.mxu0 %vm3222_vm5, %v629_v52 }
  0x6b   : > { %1700 = vmatmul.mubr.msk.f32.gmra.mrb[28].mxu1 %vm3534_vm4, %v3211_v63  ;;  %2220 = vmatprep.subr.bf16.mxu0 %v2219_v15  ;;  %v1481_v63 = vld [vmem:[%s3454_s5 + $0x50] sm:$0xff] }
  0x6c   : > { %1701 = vmatprep.mubr.msk.f32.mxu1 %vm661_vm8, %v2641_v6  ;;  %v3537_v6 = vld [vmem:[#allocation5_spill] sm:$0xff] }
  0x6d   : > { %1204 = vmatmul.mubr.f32.gmra.mrb[30].mxu0 %v2601_v48  ;;  %v3538_v48 = vld [vmem:[#allocation6_spill] sm:$0xff] }
  0x6e   : > { %2222 = vmatpush3.bf16.msra.mxu0 %v2219_v15  ;;  %2016 = vmatprep.mubr.msk.f32.mxu0 %vm2577_vm6, %v2818_v13  ;;  %v2270_v13 = vmov 0.0|0.0  }
  0x6f   : > { %1702 = vmatmul.mubr.msk.f32.gmra.mrb[30].mxu1 %vm669_vm7, %v2707_v27  ;;  %v1472_v27 = vld [vmem:[%s3454_s5 + $0x8] sm:$0xff]  ;;  %2223 = vmatprep.subr.bf16.mxu1 %v2270_v13 }
  0x70   : > { %v2224_v41 = vpack.c.bf16 %v1472_v27, %v1471_v17 }
  0x71   : > { %2017 = vmatmul.mubr.msk.f32.vlgmr.msra.gmra.mrb[32].mxu0 %vm2674_vm9, %v3535_v47 }
  0x72   : > { %2019 = vmatprep.mubr.msk.f32.mxu0 %vm2741_vm12, %v3536_v35  ;;  %2225 = vmatpush3.bf16.msra.mxu1 %v2224_v41 }
  0x73   : > { %2226 = vmatprep.subr.bf16.mxu1 %v2270_v13 }
  0x75   : > { %2020 = vmatmul.mubr.msk.f32.gmra.mrb[34].mxu0 %vm2843_vm14, %v3537_v6 }
  0x76   : > { %2022 = vmatprep.mubr.msk.f32.mxu0 %vm2934_vm0, %v3538_v48  ;;  %2228 = vmatpush3.bf16.msra.mxu1 %v2227_v44 }
  0x77   : > { %2229 = vmatprep.subr.bf16.mxu1 %v2270_v13 }
  0x79   : > { %2023 = vmatmul.mubr.msk.f32.gmra.mrb[36].mxu0 %vm3076_vm11, %v3164_v9  ;;  %v1479_v9 = vld [vmem:[%s3454_s5 + $0x40] sm:$0xff] }
  0x7a   : > { %2025 = vmatprep.mubr.msk.f32.mxu0 %vm3149_vm2, %v3220_v58  ;;  %2231 = vmatpush3.bf16.msra.mxu1 %v2230_v59  ;;  %v2236_v60 = vpack.c.bf16 %v1480_v37, %v1479_v9  ;;  %v1482_v58 = vld [vmem:[%s3454_s5 + $0x58] sm:$0xff]  ;;  %vm2271_vm2 = vmmov 0  }
  0x7b   : > { %2232 = vmatprep.subr.bf16.mxu1 %v2270_v13  ;;  %v2239_v54 = vpack.c.bf16 %v1482_v58, %v1481_v63  ;;  %2060 = vmatprep.mubr.msk.f32.mxu1 %vm2271_vm2, %v2272_v34 }
  0x7d   : > { %2026 = vmatmul.mubr.msk.f32.gmra.mrb[38].mxu0 %vm725_vm1, %v3539_v39 }
  0x7e   : > { %2234 = vmatpush3.bf16.msra.mxu1 %v2233_v20 }
  0x7f   : > { %2235 = vmatprep.subr.bf16.mxu1 %v2270_v13 }
  0x82   : > { %2237 = vmatpush3.bf16.msra.mxu1 %v2236_v60 }
  0x83   : > { %2238 = vmatprep.subr.bf16.mxu1 %v2270_v13 }
  0x86   : > { %2240 = vmatpush3.bf16.msra.mxu1 %v2239_v54 }
  0x87   : > { %2241 = vmatprep.subr.bf16.mxu1 %v2270_v13 }
  0x8a   : > { %2243 = vmatpush3.bf16.msra.mxu1 %v2242_v3 }
  0x8b   : > { %2244 = vmatprep.subr.bf16.mxu1 %v2270_v13 }
  0x8e   : > { %2246 = vmatpush3.bf16.msra.mxu1 %v2245_v7 }
 0x104   : > { %v1751_v21 = vpop.f32.mrb[0].mxu0 }
 0x105   : > { %v1807_v22 = vpop.f32.mrb[0].mxu1  ;;  %v1752_v43 = vpop.f32.mrb[1].mxu0 }
 0x106   : > { %v1753_v46 = vadd.f32 %v1752_v43, %v1751_v21  ;;  %v1808_v19 = vpop.f32.mrb[1].mxu1 }
 0x107   : > { %v1809_v49 = vadd.f32 %v1808_v19, %v1807_v22 }
 0x108   : > { %v1754_v29 = vpop.f32.mrb[2].mxu0 }
 0x109   : > { %v1066_v2 = vadd.f32 %v1809_v49, %v1753_v46  ;;  %v1810_v62 = vpop.f32.mrb[2].mxu1  ;;  %v1755_v42 = vpop.f32.mrb[3].mxu0 }
 0x10a   : > { %v1756_v32 = vadd.f32 %v1755_v42, %v1754_v29  ;;  %v1811_v4 = vpop.f32.mrb[3].mxu1 }
 0x10b   : > { %v1812_v28 = vadd.f32 %v1811_v4, %v1810_v62 }
 0x10c   : > { %v1757_v10 = vpop.f32.mrb[4].mxu0 }
 0x10d   : > { %v1071_v30 = vadd.f32 %v1812_v28, %v1756_v32  ;;  %v1813_v57 = vpop.f32.mrb[4].mxu1  ;;  %v1758_v50 = vpop.f32.mrb[5].mxu0 }
 0x10e   : > { %v1759_v11 = vadd.f32 %v1758_v50, %v1757_v10  ;;  %v1814_v53 = vpop.f32.mrb[5].mxu1 }
 0x10f   : > { %v1815_v25 = vadd.f32 %v1814_v53, %v1813_v57 }
 0x110   : > { %v1760_v8 = vpop.f32.mrb[6].mxu0 }
 0x111   : > { %v1076_v18 = vadd.f32 %v1815_v25, %v1759_v11  ;;  %v1816_v45 = vpop.f32.mrb[6].mxu1  ;;  %v1761_v16 = vpop.f32.mrb[7].mxu0 }
 0x112   : > { %v1762_v5 = vadd.f32 %v1761_v16, %v1760_v8  ;;  %v1817_v0 = vpop.f32.mrb[7].mxu1 }
 0x113   : > { %v1818_v23 = vadd.f32 %v1817_v0, %v1816_v45 }
 0x114   : > { %v1763_v12 = vpop.f32.mrb[8].mxu0 }
 0x115   : > { %v1081_v1 = vadd.f32 %v1818_v23, %v1762_v5  ;;  %v1819_v38 = vpop.f32.mrb[8].mxu1  ;;  %v1764_v52 = vpop.f32.mrb[9].mxu0 }
 0x116   : > { %v1765_v15 = vadd.f32 %v1764_v52, %v1763_v12  ;;  %v1820_v47 = vpop.f32.mrb[9].mxu1 }
 0x117   : > { %v1821_v35 = vadd.f32 %v1820_v47, %v1819_v38 }
 0x118   : > { %v1766_v6 = vpop.f32.mrb[10].mxu0 }
 0x119   : > { %v1086_v48 = vadd.f32 %v1821_v35, %v1765_v15  ;;  %v1822_v39 = vpop.f32.mrb[10].mxu1  ;;  %v1767_v17 = vpop.f32.mrb[11].mxu0 }
 0x11a   : > { %v1768_v27 = vadd.f32 %v1767_v17, %v1766_v6  ;;  %v1823_v41 = vpop.f32.mrb[11].mxu1 }
 0x11b   : > { %v1824_v13 = vadd.f32 %v1823_v41, %v1822_v39 }
 0x11c   : > { %v1769_v33 = vpop.f32.mrb[12].mxu0 }
 0x11d   : > { %v1091_v24 = vadd.f32 %v1824_v13, %v1768_v27  ;;  %v1825_v44 = vpop.f32.mrb[12].mxu1  ;;  %v1770_v56 = vpop.f32.mrb[13].mxu0 }
 0x11e   : > { %v1771_v31 = vadd.f32 %v1770_v56, %v1769_v33  ;;  %v1826_v59 = vpop.f32.mrb[13].mxu1 }
 0x11f   : > { %v1827_v51 = vadd.f32 %v1826_v59, %v1825_v44 }
 0x120   : > { %v1772_v55 = vpop.f32.mrb[14].mxu0 }
 0x121   : > { %v1096_v20 = vadd.f32 %v1827_v51, %v1771_v31  ;;  %v1828_v9 = vpop.f32.mrb[14].mxu1  ;;  %v1773_v37 = vpop.f32.mrb[15].mxu0 }
 0x122   : > { %v1774_v60 = vadd.f32 %v1773_v37, %v1772_v55  ;;  %v1829_v63 = vpop.f32.mrb[15].mxu1 }
 0x123   : > { %v1830_v58 = vadd.f32 %v1829_v63, %v1828_v9 }
 0x124   : > { %v1863_v54 = vpop.f32.mrb[16].mxu0 }
 0x125   : > { %v1101_v40 = vadd.f32 %v1830_v58, %v1774_v60  ;;  %v1864_v14 = vpop.f32.mrb[17].mxu0 }
 0x126   : > { %v1865_v3 = vadd.f32 %v1864_v14, %v1863_v54  ;;  %v1919_v36 = vpop.f32.mrb[16].mxu1 }
 0x127   : > { %v1920_v26 = vpop.f32.mrb[17].mxu1 }
 0x128   : > { %v1171_v34 = vadd.f32 %v1865_v3, %v1066_v2  ;;  %v1921_v7 = vadd.f32 %v1920_v26, %v1919_v36  ;;  %v1866_v21 = vpop.f32.mrb[18].mxu0 }
 0x129   : > { %v1867_v22 = vpop.f32.mrb[19].mxu0 }
 0x12a   : > { %v1868_v43 = vadd.f32 %v1867_v22, %v1866_v21  ;;  %v1922_v46 = vpop.f32.mrb[18].mxu1  ;;  %v1276_v19 = vadd.f32 %v1921_v7, %v1171_v34 }
 0x12b   : > { %v1923_v49 = vpop.f32.mrb[19].mxu1 }
 0x12c   : > { %v1176_v29 = vadd.f32 %v1868_v43, %v1071_v30  ;;  %v1924_v62 = vadd.f32 %v1923_v49, %v1922_v46  ;;  %v1869_v42 = vpop.f32.mrb[20].mxu0 }
 0x12d   : > { %v1870_v32 = vpop.f32.mrb[21].mxu0 }
 0x12e   : > { %v1871_v4 = vadd.f32 %v1870_v32, %v1869_v42  ;;  %v1925_v28 = vpop.f32.mrb[20].mxu1  ;;  %v1281_v10 = vadd.f32 %v1924_v62, %v1176_v29 }
 0x12f   : > { %v1926_v57 = vpop.f32.mrb[21].mxu1 }
 0x130   : > { %v1181_v50 = vadd.f32 %v1871_v4, %v1076_v18  ;;  %v1927_v11 = vadd.f32 %v1926_v57, %v1925_v28  ;;  %v1872_v53 = vpop.f32.mrb[22].mxu0 }
 0x131   : > { %v1873_v25 = vpop.f32.mrb[23].mxu0 }
 0x132   : > { %v1874_v2 = vadd.f32 %v1873_v25, %v1872_v53  ;;  %v1928_v8 = vpop.f32.mrb[22].mxu1  ;;  %v1286_v45 = vadd.f32 %v1927_v11, %v1181_v50 }
 0x133   : > { %v1929_v16 = vpop.f32.mrb[23].mxu1 }
 0x134   : > { %v1186_v5 = vadd.f32 %v1874_v2, %v1081_v1  ;;  %v1930_v0 = vadd.f32 %v1929_v16, %v1928_v8  ;;  %v1875_v23 = vpop.f32.mrb[24].mxu0 }
 0x135   : > { %v1876_v12 = vpop.f32.mrb[25].mxu0 }
 0x136   : > { %v1877_v30 = vadd.f32 %v1876_v12, %v1875_v23  ;;  %v1931_v38 = vpop.f32.mrb[24].mxu1  ;;  %v1291_v52 = vadd.f32 %v1930_v0, %v1186_v5 }
 0x137   : > { %v1932_v15 = vpop.f32.mrb[25].mxu1 }
 0x138   : > { %v1191_v47 = vadd.f32 %v1877_v30, %v1086_v48  ;;  %v1933_v35 = vadd.f32 %v1932_v15, %v1931_v38  ;;  %v1878_v6 = vpop.f32.mrb[26].mxu0 }
 0x139   : > { %v1879_v39 = vpop.f32.mrb[27].mxu0 }
 0x13a   : > { %v1880_v18 = vadd.f32 %v1879_v39, %v1878_v6  ;;  %v1934_v17 = vpop.f32.mrb[26].mxu1  ;;  %v1296_v27 = vadd.f32 %v1933_v35, %v1191_v47 }
 0x13b   : > { %v1935_v41 = vpop.f32.mrb[27].mxu1 }
 0x13c   : > { %v1196_v13 = vadd.f32 %v1880_v18, %v1091_v24  ;;  %v1936_v33 = vadd.f32 %v1935_v41, %v1934_v17  ;;  %v1881_v44 = vpop.f32.mrb[28].mxu0  ;;  %v1711_v24 = vld [vmem:[%s3452_s3] ss:$0 sm:$0xff] }
 0x13d   : > { %v1882_v56 = vpop.f32.mrb[29].mxu0 }
 0x13e   : > { %v1883_v1 = vadd.f32 %v1882_v56, %v1881_v44  ;;  %v1937_v31 = vpop.f32.mrb[28].mxu1  ;;  %v1301_v59 = vadd.f32 %v1936_v33, %v1196_v13 }
 0x13f   : > { %v1938_v51 = vpop.f32.mrb[29].mxu1 }
 0x140   : > { %v1201_v55 = vadd.f32 %v1883_v1, %v1096_v20  ;;  %v1939_v9 = vadd.f32 %v1938_v51, %v1937_v31  ;;  %v1884_v37 = vpop.f32.mrb[30].mxu0  ;;  %v1712_v20 = vld [vmem:[%s3453_s4] ss:$0 sm:$0xff] }
 0x141   : > { %v1885_v60 = vpop.f32.mrb[31].mxu0 }
 0x142   : > { %v1886_v48 = vadd.f32 %v1885_v60, %v1884_v37  ;;  %v1940_v63 = vpop.f32.mrb[30].mxu1  ;;  %v1306_v58 = vadd.f32 %v1939_v9, %v1201_v55 }
 0x143   : > { %v1941_v54 = vpop.f32.mrb[31].mxu1 }
 0x144   : > { %v1206_v14 = vadd.f32 %v1886_v48, %v1101_v40  ;;  %v1942_v3 = vadd.f32 %v1941_v54, %v1940_v63  ;;  %v2018_v36 = vpop.f32.mrb[32].mxu0 }
 0x145   : > { %v1386_v26 = vadd.f32 %v2018_v36, %v1281_v10  ;;  %v1380_v34 = vpop.f32.mrb[33].mxu0 }
 0x146   : > { %v1381_v7 = vadd.f32 %v1380_v34, %v1276_v19  ;;  %v1311_v21 = vadd.f32 %v1942_v3, %v1206_v14  ;;  %v1565_v3 = vsub.s32 0, %v2452_v61 }
 0x147   : > { %v1427_v22 = vmul.f32 %v1711_v24, %v1386_v26 }
 0x148   : > { %v1426_v43 = vmul.f32 %v1711_v24, %v1381_v7  ;;  %v2021_v46 = vpop.f32.mrb[34].mxu0 }
 0x149   : > { %v1442_v49 = vadd.f32 %v1712_v20, %v1427_v22  ;;  %v1396_v29 = vadd.f32 %v2021_v46, %v1291_v52  ;;  %v1390_v40 = vpop.f32.mrb[35].mxu0 }
 0x14a   : > { %v1441_v62 = vadd.f32 %v1712_v20, %v1426_v43  ;;  %v1391_v42 = vadd.f32 %v1390_v40, %v1286_v45 }
 0x14b   : > { %v1429_v32 = vmul.f32 %v1711_v24, %v1396_v29  ;;  %v1450_v4 = vmax.f32 %v1442_v49, 0.0 }
 0x14c   : > { %v1449_v28 = vmax.f32 %v1441_v62, 0.0  ;;  %v1428_v57 = vmul.f32 %v1711_v24, %v1391_v42  ;;  %v2024_v10 = vpop.f32.mrb[36].mxu0 }
 0x14d   : > { %v1444_v50 = vadd.f32 %v1712_v20, %v1429_v32  ;;  %v1406_v11 = vadd.f32 %v2024_v10, %v1301_v59  ;;  %v1400_v53 = vpop.f32.mrb[37].mxu0 }
 0x14e   : > { %v1443_v25 = vadd.f32 %v1712_v20, %v1428_v57  ;;  %v1401_v2 = vadd.f32 %v1400_v53, %v1296_v27  ;;  %v1457_v8 = vadd.f32 %v1450_v4, %v1449_v28 }
 0x14f   : > { %v1431_v19 = vmul.f32 %v1711_v24, %v1406_v11  ;;  %v1452_v23 = vmax.f32 %v1444_v50, 0.0 }
 0x150   : > { %v1451_v16 = vmax.f32 %v1443_v25, 0.0  ;;  %v1430_v5 = vmul.f32 %v1711_v24, %v1401_v2  ;;  %v2027_v0 = vpop.f32.mrb[38].mxu0 }
 0x151   : > { %v1416_v12 = vadd.f32 %v2027_v0, %v1311_v21  ;;  %v1410_v30 = vpop.f32.mrb[39].mxu0  ;;  %v1446_v45 = vadd.f32 %v1712_v20, %v1431_v19 }
 0x152   : > { %v1458_v38 = vadd.f32 %v1457_v8, %v1451_v16  ;;  %v1445_v52 = vadd.f32 %v1712_v20, %v1430_v5  ;;  %v1411_v15 = vadd.f32 %v1410_v30, %v1306_v58 }
 0x153   : > { %v1433_v47 = vmul.f32 %v1711_v24, %v1416_v12  ;;  %v1454_v18 = vmax.f32 %v1446_v45, 0.0 }
 0x154   : > { %v1453_v35 = vmax.f32 %v1445_v52, 0.0  ;;  %v1459_v6 = vadd.f32 %v1458_v38, %v1452_v23  ;;  %v1432_v39 = vmul.f32 %v1711_v24, %v1411_v15 }
 0x155   : > { %v1448_v41 = vadd.f32 %v1712_v20, %v1433_v47 }
 0x156   : > { %v1460_v17 = vadd.f32 %v1459_v6, %v1453_v35  ;;  %v1447_v27 = vadd.f32 %v1712_v20, %v1432_v39 }
 0x157   : > { %v1456_v44 = vmax.f32 %v1448_v41, 0.0 }
 0x158   : > { %v1455_v13 = vmax.f32 %v1447_v27, 0.0  ;;  %v1461_v33 = vadd.f32 %v1460_v17, %v1454_v18 }
 0x15a   : > { %v1462_v56 = vadd.f32 %v1461_v33, %v1455_v13 }
 0x15c   : > { %v1463_v1 = vadd.f32 %v1462_v56, %v1456_v44 }
 0x15e   : > { %v1464_v31 = vrot.slane %v1463_v1, 4 }
 0x160   : > { %v1465_v59 = vadd.f32 %v1464_v31, %v1463_v1 }
 0x162   : > { %v1466_v51 = vrot.slane %v1465_v59, 2 }
 0x164   : > { %v1467_v55 = vadd.f32 %v1466_v51, %v1465_v59 }
 0x166   : > { %v1468_v9 = vrot.slane %v1467_v55, 1 }
 0x168   : > { %v1469_v37 = vadd.f32 %v1468_v9, %v1467_v55 }
 0x16a   : > { %v1470_v60 = vmul.f32 0.00390625, %v1469_v37 }
 0x16c   : > { %2061 = vmatmul.mubr.f32.vlgmr.msra.gmra.mrb[32].mxu1 %v1470_v60 }
 0x23f   : > { %v1553_v48 = vpop.f32.mrb[32].mxu1 }
 0x240   : > { %v1713_v63 = vmul.f32 -1.442695, %v1553_v48  ;;  %v2062_v58 = vpop.f32.mrb[33].mxu1 }
 0x242   : > { %2258 = vpow2.f32 %v1713_v63 }
 0x24c   : > { %v2259_v54 = vpop.eup %2258 }
 0x24d   : > { %v1560_v14 = vadd.f32 1.0, %v2259_v54 }
 0x24f   : > { %2260 = vrcp.f32 %v1560_v14 }
 0x259   : > { %v2261_v36 = vpop.eup %2260 }
 0x25a   : > { %v1566_v24 = vrot.slane %v2261_v36, %v1565_v3 }
 0x25c   : > { %v1567_v26 = vmul.f32 %v1566_v24, %v1449_v28  ;;  %v1568_v34 = vmul.f32 %v1566_v24, %v1450_v4  ;;  %v1569_v20 = vmul.f32 %v1566_v24, %v1451_v16  ;;  %v1570_v7 = vmul.f32 %v1566_v24, %v1452_v23 }
 0x25d   : > { %v1571_v21 = vmul.f32 %v1566_v24, %v1453_v35  ;;  %v1572_v22 = vmul.f32 %v1566_v24, %v1454_v18  ;;  %v1573_v43 = vmul.f32 %v1566_v24, %v1455_v13  ;;  %v1574_v46 = vmul.f32 %v1566_v24, %v1456_v44 }
 0x25e   : > { %1575 = vst [vmem:[%s271_s11] sm:$0xff] %v1567_v26  ;;  %1576 = vst [vmem:[%s271_s11 + $0x8] sm:$0xff] %v1568_v34 }
 0x25f   : > { %1577 = vst [vmem:[%s271_s11 + $0x10] sm:$0xff] %v1569_v20  ;;  %1578 = vst [vmem:[%s271_s11 + $0x18] sm:$0xff] %v1570_v7 }
 0x260   : > { %1579 = vst [vmem:[%s271_s11 + $0x20] sm:$0xff] %v1571_v21  ;;  %1580 = vst [vmem:[%s271_s11 + $0x28] sm:$0xff] %v1572_v22 }
 0x261   : > { %1581 = vst [vmem:[%s271_s11 + $0x30] sm:$0xff] %v1573_v43  ;;  %1582 = vst [vmem:[%s271_s11 + $0x38] sm:$0xff] %v1574_v46 }
 0x262 PF: > { %s16_s21 = sadd.s32 1, %s2268_s21  }
 0x263   : > { %p13_p4 = scmp.ge.s32.totalorder %s16_s21, 4  }
 0x265   :  { %15 = sbr.rel (!%p13_p4) target bundleno = 1 (0x1), region = 77 }

</bundles_post_ra>
